<compile_context>
chip_gen: v7x
topology: tpu7x:2x2x1
jax: 0.10.0
libtpu: 0.0.40
codegen_flags: <defaults>
</compile_context>

<pallas_src>
import jax
import jax.numpy as jnp
from jax.experimental import pallas as pl
from jax.experimental.pallas import tpu as pltpu
import numpy as np

_LN_EPS = 1e-5  # PyTorch nn.LayerNorm default


# --------------------------------------------------------------------------- #
# Fused kernel: all modalities' (GRU -> last h -> LayerNorm -> Linear) -> mean
# --------------------------------------------------------------------------- #
def _make_fused_kernel(n_features, T, B, G):
    inv_n = 1.0 / n_features

    def kernel(x_ref, wih_ref, bih_ref, whh_ref, bhhn_ref,
               lnw_ref, lnb_ref, lnA_ref, wfc_ref, bfc_ref, out_ref):
        # -- fused input projection: one (T*B, sumF) @ (sumF, 3G) bf16 matmul ---
        #    (bias includes b_ih for all gates and b_hh for the r/z gates)
        xp = jnp.dot(x_ref[...], wih_ref[...],
                     preferred_element_type=jnp.float32) + bih_ref[...]   # (T*B, 3G) f32

        whh = whh_ref[...]        # (G, 3G) bf16, block-diagonal, gate-major
        bhhn = bhhn_ref[...]      # (1, G)  f32  (hidden bias of the n gate only)

        # -- fused GRU recurrence: ONE h @ W_hh per timestep for all modalities --
        # Time-major rows => xg is a contiguous leading-row slice (pre-computed,
        # off the serial h-chain).  T=8: full static unroll; for large T use
        # lax.fori_loop(..., unroll=8) instead.
        h = jnp.zeros((B, G), jnp.float32)
        for t in range(T):
            xg = xp[t * B:(t + 1) * B, :]                                  # (B, 3G)
            hg = jnp.dot(h.astype(jnp.bfloat16), whh,
                         preferred_element_type=jnp.float32)               # (B, 3G)
            # 128-lane-aligned gate groups (gate-major layout).
            r = jax.nn.sigmoid(xg[:, 0 * G:1 * G] + hg[:, 0 * G:1 * G])
            z = jax.nn.sigmoid(xg[:, 1 * G:2 * G] + hg[:, 1 * G:2 * G])
            n = jnp.tanh(xg[:, 2 * G:3 * G] + r * (hg[:, 2 * G:3 * G] + bhhn))
            h = (1.0 - z) * n + z * h

        # -- blockwise LayerNorm: per-modality mean/var via block-average matmul --
        A = lnA_ref[...]                                                   # (G, G) f32
        mu = jnp.dot(h, A, preferred_element_type=jnp.float32)             # block means
        c = h - mu
        var = jnp.dot(c * c, A, preferred_element_type=jnp.float32)        # block vars
        hn = c * jax.lax.rsqrt(var + _LN_EPS) * lnw_ref[...] + lnb_ref[...]

        # -- fused per-modality FCs (block-stacked rows) + mean over modalities --
        out = jnp.dot(hn, wfc_ref[...],
                      preferred_element_type=jnp.float32) + bfc_ref[...]
        out_ref[...] = (out * inv_n).astype(out_ref.dtype)

    return kernel


def mmgru_forward(xs, params, hidden_dim, out_dim):
    """xs[m]: (B, T, feats_dim[m]) batch-first; params in PyTorch layout."""
    n_features = len(xs)
    assert len(set(hidden_dim[:n_features])) == 1, \
        "fused block-diagonal kernel requires equal hidden dims (module implies it via fc dims)"
    H = hidden_dim[0]
    B, T = int(xs[0].shape[0]), int(xs[0].shape[1])
    feats = [int(x.shape[2]) for x in xs]
    Fsum = sum(feats)
    # Gate-group lane width: all modalities side by side, padded to a 128 multiple.
    G = ((n_features * H + 127) // 128) * 128

    f32 = np.float32
    wih = np.zeros((Fsum, 3 * G), f32)   # fused input weights (gate-major cols)
    bih = np.zeros((1, 3 * G), f32)      # b_ih (+ b_hh folded for r/z gates)
    whh = np.zeros((G, 3 * G), f32)      # block-diagonal hidden weights
    bhhn = np.zeros((1, G), f32)         # b_hh of the n gate (stays inside r*(...))
    lnw = np.zeros((1, G), f32)
    lnb = np.zeros((1, G), f32)
    lnA = np.zeros((G, G), f32)          # block-average matrix for LayerNorm mean/var
    wfc = np.zeros((G, out_dim), f32)    # block-stacked FC weights
    bfc = np.zeros((1, out_dim), f32)    # sum of per-modality FC biases

    foff = 0
    for m in range(n_features):
        F = feats[m]
        w_ih = np.asarray(params[f"w_ih{m}"], f32)   # (3H, F)  rows: r|z|n
        w_hh = np.asarray(params[f"w_hh{m}"], f32)   # (3H, H)
        b_ih = np.asarray(params[f"b_ih{m}"], f32)   # (3H,)
        b_hh = np.asarray(params[f"b_hh{m}"], f32)   # (3H,)
        c0, c1 = m * H, (m + 1) * H
        for g in range(3):
            wih[foff:foff + F, g * G + c0:g * G + c1] = w_ih[g * H:(g + 1) * H, :].T
            whh[c0:c1, g * G + c0:g * G + c1] = w_hh[g * H:(g + 1) * H, :].T
            bih[0, g * G + c0:g * G + c1] = b_ih[g * H:(g + 1) * H] + (
                b_hh[g * H:(g + 1) * H] if g < 2 else 0.0)
        bhhn[0, c0:c1] = b_hh[2 * H:3 * H]
        lnw[0, c0:c1] = np.asarray(params[f"ln_w{m}"], f32)
        lnb[0, c0:c1] = np.asarray(params[f"ln_b{m}"], f32)
        lnA[c0:c1, c0:c1] = 1.0 / H
        wfc[c0:c1, :] = np.asarray(params[f"w_fc{m}"], f32).T
        bfc[0, :] += np.asarray(params[f"b_fc{m}"], f32)
        foff += F

    # Time-major, feature-concatenated input (layout plumbing only, tiny array).
    x_cat = jnp.concatenate([jnp.asarray(x, jnp.float32) for x in xs], axis=-1)  # (B,T,sumF)
    x_tm = jnp.swapaxes(x_cat, 0, 1).reshape(T * B, Fsum).astype(jnp.bfloat16)   # (T*B,sumF)

    args = (
        x_tm,
        jnp.asarray(wih, jnp.bfloat16),
        jnp.asarray(bih),
        jnp.asarray(whh, jnp.bfloat16),
        jnp.asarray(bhhn),
        jnp.asarray(lnw),
        jnp.asarray(lnb),
        jnp.asarray(lnA),
        jnp.asarray(wfc),
        jnp.asarray(bfc),
    )

    kernel = _make_fused_kernel(n_features, T, B, G)
    return pl.pallas_call(
        kernel,
        out_shape=jax.ShapeDtypeStruct((B, out_dim), jnp.float32),
        in_specs=[pl.BlockSpec(memory_space=pltpu.MemorySpace.VMEM)] * len(args),
        out_specs=pl.BlockSpec(memory_space=pltpu.MemorySpace.VMEM),
        compiler_params=pltpu.CompilerParams(vmem_limit_bytes=32 * 1024 * 1024),
    )(*args)


# --------------------------------------------------------------------------- #
# Parameter init (PyTorch-style layouts) + precision-matched pure-JAX reference
# --------------------------------------------------------------------------- #
def init_params(key, feats_dim, hidden_dim, out_dim):
    params = {}
    n = len(feats_dim)
    keys = jax.random.split(key, 8 * n)
    for m, (F, H) in enumerate(zip(feats_dim, hidden_dim)):
        k = 1.0 / np.sqrt(H)
        ks = keys[8 * m: 8 * (m + 1)]
        params[f"w_ih{m}"] = jax.random.uniform(ks[0], (3 * H, F), jnp.float32, -k, k)
        params[f"w_hh{m}"] = jax.random.uniform(ks[1], (3 * H, H), jnp.float32, -k, k)
        params[f"b_ih{m}"] = jax.random.uniform(ks[2], (3 * H,), jnp.float32, -k, k)
        params[f"b_hh{m}"] = jax.random.uniform(ks[3], (3 * H,), jnp.float32, -k, k)
        params[f"ln_w{m}"] = 1.0 + 0.1 * jax.random.normal(ks[4], (H,), jnp.float32)
        params[f"ln_b{m}"] = 0.1 * jax.random.normal(ks[5], (H,), jnp.float32)
        params[f"w_fc{m}"] = jax.random.uniform(ks[6], (out_dim, H), jnp.float32, -k, k)
        params[f"b_fc{m}"] = jax.random.uniform(ks[7], (out_dim,), jnp.float32, -k, k)
    return params


def _gru_last_h_ref(x, w_ih, w_hh, b_ih, b_hh):
    # bf16 matmul operands / f32 accumulation, mirroring the kernel's precision.
    B, T, F = x.shape
    H = w_hh.shape[1]
    wi = jnp.asarray(w_ih, jnp.float32).astype(jnp.bfloat16)
    wh = jnp.asarray(w_hh, jnp.float32).astype(jnp.bfloat16)
    bi = jnp.asarray(b_ih, jnp.float32)
    bh = jnp.asarray(b_hh, jnp.float32)

    def step(h, x_t):
        gi = jnp.dot(x_t.astype(jnp.bfloat16), wi.T, preferred_element_type=jnp.float32) + bi
        gh = jnp.dot(h.astype(jnp.bfloat16), wh.T, preferred_element_type=jnp.float32) + bh
        r = jax.nn.sigmoid(gi[:, :H] + gh[:, :H])
        z = jax.nn.sigmoid(gi[:, H:2 * H] + gh[:, H:2 * H])
        n = jnp.tanh(gi[:, 2 * H:] + r * gh[:, 2 * H:])
        return (1.0 - z) * n + z * h, None

    h, _ = jax.lax.scan(step, jnp.zeros((B, H), jnp.float32), jnp.swapaxes(x, 0, 1))
    return h


def mmgru_ref(xs, params, hidden_dim, out_dim):
    outs = []
    for m, x in enumerate(xs):
        h = _gru_last_h_ref(x, params[f"w_ih{m}"], params[f"w_hh{m}"],
                            params[f"b_ih{m}"], params[f"b_hh{m}"])
        mu = jnp.mean(h, axis=-1, keepdims=True)
        var = jnp.mean((h - mu) ** 2, axis=-1, keepdims=True)
        hn = (h - mu) / jnp.sqrt(var + _LN_EPS) * params[f"ln_w{m}"] + params[f"ln_b{m}"]
        outs.append(hn @ params[f"w_fc{m}"].T + params[f"b_fc{m}"])
    return jnp.mean(jnp.stack(outs, axis=1), axis=1)


# --------------------------------------------------------------------------- #
if __name__ == "__main__":
    B, T = 2, 8
    n_features = 3
    feats_dim = [16, 12, 20]
    hidden_dim = [32, 32, 32]   # module's fc dims require equal hidden dims
    num_layers = [1, 1, 1]      # single-layer GRUs (see TODO above)
    out_dim = 8

    key = jax.random.PRNGKey(0)
    kx1, kx2, kx3, kp = jax.random.split(key, 4)
    xs = [
        jax.random.normal(kx1, (B, T, feats_dim[0]), jnp.float32),
        jax.random.normal(kx2, (B, T, feats_dim[1]), jnp.float32),
        jax.random.normal(kx3, (B, T, feats_dim[2]), jnp.float32),
    ]
    params = init_params(kp, feats_dim, hidden_dim, out_dim)

    out = jax.block_until_ready(mmgru_forward(xs, params, hidden_dim, out_dim))
    ref = jax.block_until_ready(mmgru_ref(xs, params, hidden_dim, out_dim))
    np.testing.assert_allclose(np.asarray(out), np.asarray(ref), rtol=5e-3, atol=5e-3)

    print("KERNEL_OK")
</pallas_src>

<mosaic_0001>
module attributes {stable_mosaic.version = 11 : i64} {
  func.func @kernel(%arg0: memref<16x48xbf16, #tpu.memory_space<vmem>>, %arg1: memref<48x384xbf16, #tpu.memory_space<vmem>>, %arg2: memref<1x384xf32, #tpu.memory_space<vmem>>, %arg3: memref<128x384xbf16, #tpu.memory_space<vmem>>, %arg4: memref<1x128xf32, #tpu.memory_space<vmem>>, %arg5: memref<1x128xf32, #tpu.memory_space<vmem>>, %arg6: memref<1x128xf32, #tpu.memory_space<vmem>>, %arg7: memref<128x128xf32, #tpu.memory_space<vmem>>, %arg8: memref<128x8xf32, #tpu.memory_space<vmem>>, %arg9: memref<1x8xf32, #tpu.memory_space<vmem>>, %arg10: memref<2x8xf32, #tpu.memory_space<vmem>>) attributes {dimension_semantics = [], scalar_prefetch = 0 : i64, scratch_operands = 0 : i64, tpu.core_type = #tpu.core_type<tc>} {
    %c0 = arith.constant 0 : index
    %c0_0 = arith.constant 0 : index
    %0 = vector.load %arg0[%c0, %c0_0] : memref<16x48xbf16, #tpu.memory_space<vmem>>, vector<16x48xbf16>
    %c0_1 = arith.constant 0 : index
    %c0_2 = arith.constant 0 : index
    %1 = vector.load %arg1[%c0_1, %c0_2] : memref<48x384xbf16, #tpu.memory_space<vmem>>, vector<48x384xbf16>
    %cst = arith.constant dense<0.000000e+00> : vector<16x384xf32>
    %2 = tpu.matmul %0, %1, %cst {dimension_numbers = #tpu.dot_dimension_numbers<[1], [0], [0], [1], [0, 0, 1, 1], [], []>} : vector<16x48xbf16>, vector<48x384xbf16>, vector<16x384xf32> -> vector<16x384xf32>
    %c0_3 = arith.constant 0 : index
    %c0_4 = arith.constant 0 : index
    %3 = vector.load %arg2[%c0_3, %c0_4] : memref<1x384xf32, #tpu.memory_space<vmem>>, vector<1x384xf32>
    %4 = vector.broadcast %3 : vector<1x384xf32> to vector<16x384xf32>
    %5 = arith.addf %2, %4 : vector<16x384xf32>
    %c0_5 = arith.constant 0 : index
    %c0_6 = arith.constant 0 : index
    %6 = vector.load %arg3[%c0_5, %c0_6] : memref<128x384xbf16, #tpu.memory_space<vmem>>, vector<128x384xbf16>
    %c0_7 = arith.constant 0 : index
    %c0_8 = arith.constant 0 : index
    %7 = vector.load %arg4[%c0_7, %c0_8] : memref<1x128xf32, #tpu.memory_space<vmem>>, vector<1x128xf32>
    %cst_9 = arith.constant 0.000000e+00 : f32
    %8 = vector.broadcast %cst_9 : f32 to vector<2x128xf32>
    %9 = vector.extract_strided_slice %5 {offsets = [0, 0], sizes = [2, 384], strides = [1, 1]} : vector<16x384xf32> to vector<2x384xf32>
    %10 = arith.truncf %8 : vector<2x128xf32> to vector<2x128xbf16>
    %cst_10 = arith.constant dense<0.000000e+00> : vector<2x384xf32>
    %11 = tpu.matmul %10, %6, %cst_10 {dimension_numbers = #tpu.dot_dimension_numbers<[1], [0], [0], [1], [0, 0, 1, 1], [], []>} : vector<2x128xbf16>, vector<128x384xbf16>, vector<2x384xf32> -> vector<2x384xf32>
    %12 = vector.extract_strided_slice %9 {offsets = [0, 0], sizes = [2, 128], strides = [1, 1]} : vector<2x384xf32> to vector<2x128xf32>
    %13 = vector.extract_strided_slice %11 {offsets = [0, 0], sizes = [2, 128], strides = [1, 1]} : vector<2x384xf32> to vector<2x128xf32>
    %14 = arith.addf %12, %13 : vector<2x128xf32>
    %15 = arith.negf %14 : vector<2x128xf32>
    %16 = math.exp %15 : vector<2x128xf32>
    %cst_11 = arith.constant 1.000000e+00 : f32
    %17 = vector.broadcast %cst_11 : f32 to vector<2x128xf32>
    %18 = arith.addf %17, %16 : vector<2x128xf32>
    %19 = arith.divf %17, %18 : vector<2x128xf32>
    %20 = vector.extract_strided_slice %9 {offsets = [0, 128], sizes = [2, 128], strides = [1, 1]} : vector<2x384xf32> to vector<2x128xf32>
    %21 = vector.extract_strided_slice %11 {offsets = [0, 128], sizes = [2, 128], strides = [1, 1]} : vector<2x384xf32> to vector<2x128xf32>
    %22 = arith.addf %20, %21 : vector<2x128xf32>
    %23 = arith.negf %22 : vector<2x128xf32>
    %24 = math.exp %23 : vector<2x128xf32>
    %cst_12 = arith.constant 1.000000e+00 : f32
    %25 = vector.broadcast %cst_12 : f32 to vector<2x128xf32>
    %26 = arith.addf %25, %24 : vector<2x128xf32>
    %27 = arith.divf %25, %26 : vector<2x128xf32>
    %28 = vector.extract_strided_slice %9 {offsets = [0, 256], sizes = [2, 128], strides = [1, 1]} : vector<2x384xf32> to vector<2x128xf32>
    %29 = vector.extract_strided_slice %11 {offsets = [0, 256], sizes = [2, 128], strides = [1, 1]} : vector<2x384xf32> to vector<2x128xf32>
    %30 = vector.broadcast %7 : vector<1x128xf32> to vector<2x128xf32>
    %31 = arith.addf %29, %30 : vector<2x128xf32>
    %32 = arith.mulf %19, %31 : vector<2x128xf32>
    %33 = arith.addf %28, %32 : vector<2x128xf32>
    %34 = math.tanh %33 : vector<2x128xf32>
    %cst_13 = arith.constant 1.000000e+00 : f32
    %35 = vector.broadcast %cst_13 : f32 to vector<2x128xf32>
    %36 = arith.subf %35, %27 : vector<2x128xf32>
    %37 = arith.mulf %36, %34 : vector<2x128xf32>
    %38 = arith.mulf %27, %8 : vector<2x128xf32>
    %39 = arith.addf %37, %38 : vector<2x128xf32>
    %40 = vector.extract_strided_slice %5 {offsets = [2, 0], sizes = [2, 384], strides = [1, 1]} : vector<16x384xf32> to vector<2x384xf32>
    %41 = arith.truncf %39 : vector<2x128xf32> to vector<2x128xbf16>
    %cst_14 = arith.constant dense<0.000000e+00> : vector<2x384xf32>
    %42 = tpu.matmul %41, %6, %cst_14 {dimension_numbers = #tpu.dot_dimension_numbers<[1], [0], [0], [1], [0, 0, 1, 1], [], []>} : vector<2x128xbf16>, vector<128x384xbf16>, vector<2x384xf32> -> vector<2x384xf32>
    %43 = vector.extract_strided_slice %40 {offsets = [0, 0], sizes = [2, 128], strides = [1, 1]} : vector<2x384xf32> to vector<2x128xf32>
    %44 = vector.extract_strided_slice %42 {offsets = [0, 0], sizes = [2, 128], strides = [1, 1]} : vector<2x384xf32> to vector<2x128xf32>
    %45 = arith.addf %43, %44 : vector<2x128xf32>
    %46 = arith.negf %45 : vector<2x128xf32>
    %47 = math.exp %46 : vector<2x128xf32>
    %cst_15 = arith.constant 1.000000e+00 : f32
    %48 = vector.broadcast %cst_15 : f32 to vector<2x128xf32>
    %49 = arith.addf %48, %47 : vector<2x128xf32>
    %50 = arith.divf %48, %49 : vector<2x128xf32>
    %51 = vector.extract_strided_slice %40 {offsets = [0, 128], sizes = [2, 128], strides = [1, 1]} : vector<2x384xf32> to vector<2x128xf32>
    %52 = vector.extract_strided_slice %42 {offsets = [0, 128], sizes = [2, 128], strides = [1, 1]} : vector<2x384xf32> to vector<2x128xf32>
    %53 = arith.addf %51, %52 : vector<2x128xf32>
    %54 = arith.negf %53 : vector<2x128xf32>
    %55 = math.exp %54 : vector<2x128xf32>
    %cst_16 = arith.constant 1.000000e+00 : f32
    %56 = vector.broadcast %cst_16 : f32 to vector<2x128xf32>
    %57 = arith.addf %56, %55 : vector<2x128xf32>
    %58 = arith.divf %56, %57 : vector<2x128xf32>
    %59 = vector.extract_strided_slice %40 {offsets = [0, 256], sizes = [2, 128], strides = [1, 1]} : vector<2x384xf32> to vector<2x128xf32>
    %60 = vector.extract_strided_slice %42 {offsets = [0, 256], sizes = [2, 128], strides = [1, 1]} : vector<2x384xf32> to vector<2x128xf32>
    %61 = vector.broadcast %7 : vector<1x128xf32> to vector<2x128xf32>
    %62 = arith.addf %60, %61 : vector<2x128xf32>
    %63 = arith.mulf %50, %62 : vector<2x128xf32>
    %64 = arith.addf %59, %63 : vector<2x128xf32>
    %65 = math.tanh %64 : vector<2x128xf32>
    %cst_17 = arith.constant 1.000000e+00 : f32
    %66 = vector.broadcast %cst_17 : f32 to vector<2x128xf32>
    %67 = arith.subf %66, %58 : vector<2x128xf32>
    %68 = arith.mulf %67, %65 : vector<2x128xf32>
    %69 = arith.mulf %58, %39 : vector<2x128xf32>
    %70 = arith.addf %68, %69 : vector<2x128xf32>
    %71 = vector.extract_strided_slice %5 {offsets = [4, 0], sizes = [2, 384], strides = [1, 1]} : vector<16x384xf32> to vector<2x384xf32>
    %72 = arith.truncf %70 : vector<2x128xf32> to vector<2x128xbf16>
    %cst_18 = arith.constant dense<0.000000e+00> : vector<2x384xf32>
    %73 = tpu.matmul %72, %6, %cst_18 {dimension_numbers = #tpu.dot_dimension_numbers<[1], [0], [0], [1], [0, 0, 1, 1], [], []>} : vector<2x128xbf16>, vector<128x384xbf16>, vector<2x384xf32> -> vector<2x384xf32>
    %74 = vector.extract_strided_slice %71 {offsets = [0, 0], sizes = [2, 128], strides = [1, 1]} : vector<2x384xf32> to vector<2x128xf32>
    %75 = vector.extract_strided_slice %73 {offsets = [0, 0], sizes = [2, 128], strides = [1, 1]} : vector<2x384xf32> to vector<2x128xf32>
    %76 = arith.addf %74, %75 : vector<2x128xf32>
    %77 = arith.negf %76 : vector<2x128xf32>
    %78 = math.exp %77 : vector<2x128xf32>
    %cst_19 = arith.constant 1.000000e+00 : f32
    %79 = vector.broadcast %cst_19 : f32 to vector<2x128xf32>
    %80 = arith.addf %79, %78 : vector<2x128xf32>
    %81 = arith.divf %79, %80 : vector<2x128xf32>
    %82 = vector.extract_strided_slice %71 {offsets = [0, 128], sizes = [2, 128], strides = [1, 1]} : vector<2x384xf32> to vector<2x128xf32>
    %83 = vector.extract_strided_slice %73 {offsets = [0, 128], sizes = [2, 128], strides = [1, 1]} : vector<2x384xf32> to vector<2x128xf32>
    %84 = arith.addf %82, %83 : vector<2x128xf32>
    %85 = arith.negf %84 : vector<2x128xf32>
    %86 = math.exp %85 : vector<2x128xf32>
    %cst_20 = arith.constant 1.000000e+00 : f32
    %87 = vector.broadcast %cst_20 : f32 to vector<2x128xf32>
    %88 = arith.addf %87, %86 : vector<2x128xf32>
    %89 = arith.divf %87, %88 : vector<2x128xf32>
    %90 = vector.extract_strided_slice %71 {offsets = [0, 256], sizes = [2, 128], strides = [1, 1]} : vector<2x384xf32> to vector<2x128xf32>
    %91 = vector.extract_strided_slice %73 {offsets = [0, 256], sizes = [2, 128], strides = [1, 1]} : vector<2x384xf32> to vector<2x128xf32>
    %92 = vector.broadcast %7 : vector<1x128xf32> to vector<2x128xf32>
    %93 = arith.addf %91, %92 : vector<2x128xf32>
    %94 = arith.mulf %81, %93 : vector<2x128xf32>
    %95 = arith.addf %90, %94 : vector<2x128xf32>
    %96 = math.tanh %95 : vector<2x128xf32>
    %cst_21 = arith.constant 1.000000e+00 : f32
    %97 = vector.broadcast %cst_21 : f32 to vector<2x128xf32>
    %98 = arith.subf %97, %89 : vector<2x128xf32>
    %99 = arith.mulf %98, %96 : vector<2x128xf32>
    %100 = arith.mulf %89, %70 : vector<2x128xf32>
    %101 = arith.addf %99, %100 : vector<2x128xf32>
    %102 = vector.extract_strided_slice %5 {offsets = [6, 0], sizes = [2, 384], strides = [1, 1]} : vector<16x384xf32> to vector<2x384xf32>
    %103 = arith.truncf %101 : vector<2x128xf32> to vector<2x128xbf16>
    %cst_22 = arith.constant dense<0.000000e+00> : vector<2x384xf32>
    %104 = tpu.matmul %103, %6, %cst_22 {dimension_numbers = #tpu.dot_dimension_numbers<[1], [0], [0], [1], [0, 0, 1, 1], [], []>} : vector<2x128xbf16>, vector<128x384xbf16>, vector<2x384xf32> -> vector<2x384xf32>
    %105 = vector.extract_strided_slice %102 {offsets = [0, 0], sizes = [2, 128], strides = [1, 1]} : vector<2x384xf32> to vector<2x128xf32>
    %106 = vector.extract_strided_slice %104 {offsets = [0, 0], sizes = [2, 128], strides = [1, 1]} : vector<2x384xf32> to vector<2x128xf32>
    %107 = arith.addf %105, %106 : vector<2x128xf32>
    %108 = arith.negf %107 : vector<2x128xf32>
    %109 = math.exp %108 : vector<2x128xf32>
    %cst_23 = arith.constant 1.000000e+00 : f32
    %110 = vector.broadcast %cst_23 : f32 to vector<2x128xf32>
    %111 = arith.addf %110, %109 : vector<2x128xf32>
    %112 = arith.divf %110, %111 : vector<2x128xf32>
    %113 = vector.extract_strided_slice %102 {offsets = [0, 128], sizes = [2, 128], strides = [1, 1]} : vector<2x384xf32> to vector<2x128xf32>
    %114 = vector.extract_strided_slice %104 {offsets = [0, 128], sizes = [2, 128], strides = [1, 1]} : vector<2x384xf32> to vector<2x128xf32>
    %115 = arith.addf %113, %114 : vector<2x128xf32>
    %116 = arith.negf %115 : vector<2x128xf32>
    %117 = math.exp %116 : vector<2x128xf32>
    %cst_24 = arith.constant 1.000000e+00 : f32
    %118 = vector.broadcast %cst_24 : f32 to vector<2x128xf32>
    %119 = arith.addf %118, %117 : vector<2x128xf32>
    %120 = arith.divf %118, %119 : vector<2x128xf32>
    %121 = vector.extract_strided_slice %102 {offsets = [0, 256], sizes = [2, 128], strides = [1, 1]} : vector<2x384xf32> to vector<2x128xf32>
    %122 = vector.extract_strided_slice %104 {offsets = [0, 256], sizes = [2, 128], strides = [1, 1]} : vector<2x384xf32> to vector<2x128xf32>
    %123 = vector.broadcast %7 : vector<1x128xf32> to vector<2x128xf32>
    %124 = arith.addf %122, %123 : vector<2x128xf32>
    %125 = arith.mulf %112, %124 : vector<2x128xf32>
    %126 = arith.addf %121, %125 : vector<2x128xf32>
    %127 = math.tanh %126 : vector<2x128xf32>
    %cst_25 = arith.constant 1.000000e+00 : f32
    %128 = vector.broadcast %cst_25 : f32 to vector<2x128xf32>
    %129 = arith.subf %128, %120 : vector<2x128xf32>
    %130 = arith.mulf %129, %127 : vector<2x128xf32>
    %131 = arith.mulf %120, %101 : vector<2x128xf32>
    %132 = arith.addf %130, %131 : vector<2x128xf32>
    %133 = vector.extract_strided_slice %5 {offsets = [8, 0], sizes = [2, 384], strides = [1, 1]} : vector<16x384xf32> to vector<2x384xf32>
    %134 = arith.truncf %132 : vector<2x128xf32> to vector<2x128xbf16>
    %cst_26 = arith.constant dense<0.000000e+00> : vector<2x384xf32>
    %135 = tpu.matmul %134, %6, %cst_26 {dimension_numbers = #tpu.dot_dimension_numbers<[1], [0], [0], [1], [0, 0, 1, 1], [], []>} : vector<2x128xbf16>, vector<128x384xbf16>, vector<2x384xf32> -> vector<2x384xf32>
    %136 = vector.extract_strided_slice %133 {offsets = [0, 0], sizes = [2, 128], strides = [1, 1]} : vector<2x384xf32> to vector<2x128xf32>
    %137 = vector.extract_strided_slice %135 {offsets = [0, 0], sizes = [2, 128], strides = [1, 1]} : vector<2x384xf32> to vector<2x128xf32>
    %138 = arith.addf %136, %137 : vector<2x128xf32>
    %139 = arith.negf %138 : vector<2x128xf32>
    %140 = math.exp %139 : vector<2x128xf32>
    %cst_27 = arith.constant 1.000000e+00 : f32
    %141 = vector.broadcast %cst_27 : f32 to vector<2x128xf32>
    %142 = arith.addf %141, %140 : vector<2x128xf32>
    %143 = arith.divf %141, %142 : vector<2x128xf32>
    %144 = vector.extract_strided_slice %133 {offsets = [0, 128], sizes = [2, 128], strides = [1, 1]} : vector<2x384xf32> to vector<2x128xf32>
    %145 = vector.extract_strided_slice %135 {offsets = [0, 128], sizes = [2, 128], strides = [1, 1]} : vector<2x384xf32> to vector<2x128xf32>
    %146 = arith.addf %144, %145 : vector<2x128xf32>
    %147 = arith.negf %146 : vector<2x128xf32>
    %148 = math.exp %147 : vector<2x128xf32>
    %cst_28 = arith.constant 1.000000e+00 : f32
    %149 = vector.broadcast %cst_28 : f32 to vector<2x128xf32>
    %150 = arith.addf %149, %148 : vector<2x128xf32>
    %151 = arith.divf %149, %150 : vector<2x128xf32>
    %152 = vector.extract_strided_slice %133 {offsets = [0, 256], sizes = [2, 128], strides = [1, 1]} : vector<2x384xf32> to vector<2x128xf32>
    %153 = vector.extract_strided_slice %135 {offsets = [0, 256], sizes = [2, 128], strides = [1, 1]} : vector<2x384xf32> to vector<2x128xf32>
    %154 = vector.broadcast %7 : vector<1x128xf32> to vector<2x128xf32>
    %155 = arith.addf %153, %154 : vector<2x128xf32>
    %156 = arith.mulf %143, %155 : vector<2x128xf32>
    %157 = arith.addf %152, %156 : vector<2x128xf32>
    %158 = math.tanh %157 : vector<2x128xf32>
    %cst_29 = arith.constant 1.000000e+00 : f32
    %159 = vector.broadcast %cst_29 : f32 to vector<2x128xf32>
    %160 = arith.subf %159, %151 : vector<2x128xf32>
    %161 = arith.mulf %160, %158 : vector<2x128xf32>
    %162 = arith.mulf %151, %132 : vector<2x128xf32>
    %163 = arith.addf %161, %162 : vector<2x128xf32>
    %164 = vector.extract_strided_slice %5 {offsets = [10, 0], sizes = [2, 384], strides = [1, 1]} : vector<16x384xf32> to vector<2x384xf32>
    %165 = arith.truncf %163 : vector<2x128xf32> to vector<2x128xbf16>
    %cst_30 = arith.constant dense<0.000000e+00> : vector<2x384xf32>
    %166 = tpu.matmul %165, %6, %cst_30 {dimension_numbers = #tpu.dot_dimension_numbers<[1], [0], [0], [1], [0, 0, 1, 1], [], []>} : vector<2x128xbf16>, vector<128x384xbf16>, vector<2x384xf32> -> vector<2x384xf32>
    %167 = vector.extract_strided_slice %164 {offsets = [0, 0], sizes = [2, 128], strides = [1, 1]} : vector<2x384xf32> to vector<2x128xf32>
    %168 = vector.extract_strided_slice %166 {offsets = [0, 0], sizes = [2, 128], strides = [1, 1]} : vector<2x384xf32> to vector<2x128xf32>
    %169 = arith.addf %167, %168 : vector<2x128xf32>
    %170 = arith.negf %169 : vector<2x128xf32>
    %171 = math.exp %170 : vector<2x128xf32>
    %cst_31 = arith.constant 1.000000e+00 : f32
    %172 = vector.broadcast %cst_31 : f32 to vector<2x128xf32>
    %173 = arith.addf %172, %171 : vector<2x128xf32>
    %174 = arith.divf %172, %173 : vector<2x128xf32>
    %175 = vector.extract_strided_slice %164 {offsets = [0, 128], sizes = [2, 128], strides = [1, 1]} : vector<2x384xf32> to vector<2x128xf32>
    %176 = vector.extract_strided_slice %166 {offsets = [0, 128], sizes = [2, 128], strides = [1, 1]} : vector<2x384xf32> to vector<2x128xf32>
    %177 = arith.addf %175, %176 : vector<2x128xf32>
    %178 = arith.negf %177 : vector<2x128xf32>
    %179 = math.exp %178 : vector<2x128xf32>
    %cst_32 = arith.constant 1.000000e+00 : f32
    %180 = vector.broadcast %cst_32 : f32 to vector<2x128xf32>
    %181 = arith.addf %180, %179 : vector<2x128xf32>
    %182 = arith.divf %180, %181 : vector<2x128xf32>
    %183 = vector.extract_strided_slice %164 {offsets = [0, 256], sizes = [2, 128], strides = [1, 1]} : vector<2x384xf32> to vector<2x128xf32>
    %184 = vector.extract_strided_slice %166 {offsets = [0, 256], sizes = [2, 128], strides = [1, 1]} : vector<2x384xf32> to vector<2x128xf32>
    %185 = vector.broadcast %7 : vector<1x128xf32> to vector<2x128xf32>
    %186 = arith.addf %184, %185 : vector<2x128xf32>
    %187 = arith.mulf %174, %186 : vector<2x128xf32>
    %188 = arith.addf %183, %187 : vector<2x128xf32>
    %189 = math.tanh %188 : vector<2x128xf32>
    %cst_33 = arith.constant 1.000000e+00 : f32
    %190 = vector.broadcast %cst_33 : f32 to vector<2x128xf32>
    %191 = arith.subf %190, %182 : vector<2x128xf32>
    %192 = arith.mulf %191, %189 : vector<2x128xf32>
    %193 = arith.mulf %182, %163 : vector<2x128xf32>
    %194 = arith.addf %192, %193 : vector<2x128xf32>
    %195 = vector.extract_strided_slice %5 {offsets = [12, 0], sizes = [2, 384], strides = [1, 1]} : vector<16x384xf32> to vector<2x384xf32>
    %196 = arith.truncf %194 : vector<2x128xf32> to vector<2x128xbf16>
    %cst_34 = arith.constant dense<0.000000e+00> : vector<2x384xf32>
    %197 = tpu.matmul %196, %6, %cst_34 {dimension_numbers = #tpu.dot_dimension_numbers<[1], [0], [0], [1], [0, 0, 1, 1], [], []>} : vector<2x128xbf16>, vector<128x384xbf16>, vector<2x384xf32> -> vector<2x384xf32>
    %198 = vector.extract_strided_slice %195 {offsets = [0, 0], sizes = [2, 128], strides = [1, 1]} : vector<2x384xf32> to vector<2x128xf32>
    %199 = vector.extract_strided_slice %197 {offsets = [0, 0], sizes = [2, 128], strides = [1, 1]} : vector<2x384xf32> to vector<2x128xf32>
    %200 = arith.addf %198, %199 : vector<2x128xf32>
    %201 = arith.negf %200 : vector<2x128xf32>
    %202 = math.exp %201 : vector<2x128xf32>
    %cst_35 = arith.constant 1.000000e+00 : f32
    %203 = vector.broadcast %cst_35 : f32 to vector<2x128xf32>
    %204 = arith.addf %203, %202 : vector<2x128xf32>
    %205 = arith.divf %203, %204 : vector<2x128xf32>
    %206 = vector.extract_strided_slice %195 {offsets = [0, 128], sizes = [2, 128], strides = [1, 1]} : vector<2x384xf32> to vector<2x128xf32>
    %207 = vector.extract_strided_slice %197 {offsets = [0, 128], sizes = [2, 128], strides = [1, 1]} : vector<2x384xf32> to vector<2x128xf32>
    %208 = arith.addf %206, %207 : vector<2x128xf32>
    %209 = arith.negf %208 : vector<2x128xf32>
    %210 = math.exp %209 : vector<2x128xf32>
    %cst_36 = arith.constant 1.000000e+00 : f32
    %211 = vector.broadcast %cst_36 : f32 to vector<2x128xf32>
    %212 = arith.addf %211, %210 : vector<2x128xf32>
    %213 = arith.divf %211, %212 : vector<2x128xf32>
    %214 = vector.extract_strided_slice %195 {offsets = [0, 256], sizes = [2, 128], strides = [1, 1]} : vector<2x384xf32> to vector<2x128xf32>
    %215 = vector.extract_strided_slice %197 {offsets = [0, 256], sizes = [2, 128], strides = [1, 1]} : vector<2x384xf32> to vector<2x128xf32>
    %216 = vector.broadcast %7 : vector<1x128xf32> to vector<2x128xf32>
    %217 = arith.addf %215, %216 : vector<2x128xf32>
    %218 = arith.mulf %205, %217 : vector<2x128xf32>
    %219 = arith.addf %214, %218 : vector<2x128xf32>
    %220 = math.tanh %219 : vector<2x128xf32>
    %cst_37 = arith.constant 1.000000e+00 : f32
    %221 = vector.broadcast %cst_37 : f32 to vector<2x128xf32>
    %222 = arith.subf %221, %213 : vector<2x128xf32>
    %223 = arith.mulf %222, %220 : vector<2x128xf32>
    %224 = arith.mulf %213, %194 : vector<2x128xf32>
    %225 = arith.addf %223, %224 : vector<2x128xf32>
    %226 = vector.extract_strided_slice %5 {offsets = [14, 0], sizes = [2, 384], strides = [1, 1]} : vector<16x384xf32> to vector<2x384xf32>
    %227 = arith.truncf %225 : vector<2x128xf32> to vector<2x128xbf16>
    %cst_38 = arith.constant dense<0.000000e+00> : vector<2x384xf32>
    %228 = tpu.matmul %227, %6, %cst_38 {dimension_numbers = #tpu.dot_dimension_numbers<[1], [0], [0], [1], [0, 0, 1, 1], [], []>} : vector<2x128xbf16>, vector<128x384xbf16>, vector<2x384xf32> -> vector<2x384xf32>
    %229 = vector.extract_strided_slice %226 {offsets = [0, 0], sizes = [2, 128], strides = [1, 1]} : vector<2x384xf32> to vector<2x128xf32>
    %230 = vector.extract_strided_slice %228 {offsets = [0, 0], sizes = [2, 128], strides = [1, 1]} : vector<2x384xf32> to vector<2x128xf32>
    %231 = arith.addf %229, %230 : vector<2x128xf32>
    %232 = arith.negf %231 : vector<2x128xf32>
    %233 = math.exp %232 : vector<2x128xf32>
    %cst_39 = arith.constant 1.000000e+00 : f32
    %234 = vector.broadcast %cst_39 : f32 to vector<2x128xf32>
    %235 = arith.addf %234, %233 : vector<2x128xf32>
    %236 = arith.divf %234, %235 : vector<2x128xf32>
    %237 = vector.extract_strided_slice %226 {offsets = [0, 128], sizes = [2, 128], strides = [1, 1]} : vector<2x384xf32> to vector<2x128xf32>
    %238 = vector.extract_strided_slice %228 {offsets = [0, 128], sizes = [2, 128], strides = [1, 1]} : vector<2x384xf32> to vector<2x128xf32>
    %239 = arith.addf %237, %238 : vector<2x128xf32>
    %240 = arith.negf %239 : vector<2x128xf32>
    %241 = math.exp %240 : vector<2x128xf32>
    %cst_40 = arith.constant 1.000000e+00 : f32
    %242 = vector.broadcast %cst_40 : f32 to vector<2x128xf32>
    %243 = arith.addf %242, %241 : vector<2x128xf32>
    %244 = arith.divf %242, %243 : vector<2x128xf32>
    %245 = vector.extract_strided_slice %226 {offsets = [0, 256], sizes = [2, 128], strides = [1, 1]} : vector<2x384xf32> to vector<2x128xf32>
    %246 = vector.extract_strided_slice %228 {offsets = [0, 256], sizes = [2, 128], strides = [1, 1]} : vector<2x384xf32> to vector<2x128xf32>
    %247 = vector.broadcast %7 : vector<1x128xf32> to vector<2x128xf32>
    %248 = arith.addf %246, %247 : vector<2x128xf32>
    %249 = arith.mulf %236, %248 : vector<2x128xf32>
    %250 = arith.addf %245, %249 : vector<2x128xf32>
    %251 = math.tanh %250 : vector<2x128xf32>
    %cst_41 = arith.constant 1.000000e+00 : f32
    %252 = vector.broadcast %cst_41 : f32 to vector<2x128xf32>
    %253 = arith.subf %252, %244 : vector<2x128xf32>
    %254 = arith.mulf %253, %251 : vector<2x128xf32>
    %255 = arith.mulf %244, %225 : vector<2x128xf32>
    %256 = arith.addf %254, %255 : vector<2x128xf32>
    %c0_42 = arith.constant 0 : index
    %c0_43 = arith.constant 0 : index
    %257 = vector.load %arg7[%c0_42, %c0_43] : memref<128x128xf32, #tpu.memory_space<vmem>>, vector<128x128xf32>
    %cst_44 = arith.constant dense<0.000000e+00> : vector<2x128xf32>
    %258 = tpu.matmul %256, %257, %cst_44 {dimension_numbers = #tpu.dot_dimension_numbers<[1], [0], [0], [1], [0, 0, 1, 1], [], []>} : vector<2x128xf32>, vector<128x128xf32>, vector<2x128xf32> -> vector<2x128xf32>
    %259 = arith.subf %256, %258 : vector<2x128xf32>
    %260 = arith.mulf %259, %259 : vector<2x128xf32>
    %cst_45 = arith.constant dense<0.000000e+00> : vector<2x128xf32>
    %261 = tpu.matmul %260, %257, %cst_45 {dimension_numbers = #tpu.dot_dimension_numbers<[1], [0], [0], [1], [0, 0, 1, 1], [], []>} : vector<2x128xf32>, vector<128x128xf32>, vector<2x128xf32> -> vector<2x128xf32>
    %cst_46 = arith.constant 9.99999974E-6 : f32
    %262 = vector.broadcast %cst_46 : f32 to vector<2x128xf32>
    %263 = arith.addf %261, %262 : vector<2x128xf32>
    %264 = math.rsqrt %263 : vector<2x128xf32>
    %265 = arith.mulf %259, %264 : vector<2x128xf32>
    %c0_47 = arith.constant 0 : index
    %c0_48 = arith.constant 0 : index
    %266 = vector.load %arg5[%c0_47, %c0_48] : memref<1x128xf32, #tpu.memory_space<vmem>>, vector<1x128xf32>
    %267 = vector.broadcast %266 : vector<1x128xf32> to vector<2x128xf32>
    %268 = arith.mulf %265, %267 : vector<2x128xf32>
    %c0_49 = arith.constant 0 : index
    %c0_50 = arith.constant 0 : index
    %269 = vector.load %arg6[%c0_49, %c0_50] : memref<1x128xf32, #tpu.memory_space<vmem>>, vector<1x128xf32>
    %270 = vector.broadcast %269 : vector<1x128xf32> to vector<2x128xf32>
    %271 = arith.addf %268, %270 : vector<2x128xf32>
    %c0_51 = arith.constant 0 : index
    %c0_52 = arith.constant 0 : index
    %272 = vector.load %arg8[%c0_51, %c0_52] : memref<128x8xf32, #tpu.memory_space<vmem>>, vector<128x8xf32>
    %cst_53 = arith.constant dense<0.000000e+00> : vector<2x8xf32>
    %273 = tpu.matmul %271, %272, %cst_53 {dimension_numbers = #tpu.dot_dimension_numbers<[1], [0], [0], [1], [0, 0, 1, 1], [], []>} : vector<2x128xf32>, vector<128x8xf32>, vector<2x8xf32> -> vector<2x8xf32>
    %c0_54 = arith.constant 0 : index
    %c0_55 = arith.constant 0 : index
    %274 = vector.load %arg9[%c0_54, %c0_55] : memref<1x8xf32, #tpu.memory_space<vmem>>, vector<1x8xf32>
    %275 = vector.broadcast %274 : vector<1x8xf32> to vector<2x8xf32>
    %276 = arith.addf %273, %275 : vector<2x8xf32>
    %cst_56 = arith.constant 0.333333343 : f32
    %277 = vector.broadcast %cst_56 : f32 to vector<2x8xf32>
    %278 = arith.mulf %276, %277 : vector<2x8xf32>
    %c0_57 = arith.constant 0 : index
    %c0_58 = arith.constant 0 : index
    %279 = vector.load %arg10[%c0_57, %c0_58] : memref<2x8xf32, #tpu.memory_space<vmem>>, vector<2x8xf32>
    tpu.vector_store %arg10[%c0_57, %c0_58], %278 {strides = array<i32>} : memref<2x8xf32, #tpu.memory_space<vmem>>, vector<2x8xf32>,
    return
  }
}

</mosaic_0001>

<bundles_post_ra>
// kernel: tpu_custom_call.1
= control target key start
LH: loop header
LB: loop body
LE: loop exit
PB: predicated region body
PF: predicated region fallthrough
CT: control target
= control target key end

     0   :  { %15 = vsyncpa [#allocation3], 0  ;;  %s3032_s0 = inlined_call_operand.vmem [shape: bf16[16,48], index: 0, kind: input, shape index: {}]   ;;  %s3033_s1 = inlined_call_operand.hbm [shape: bf16[48,384], index: 1, kind: input, shape index: {}]   ;;  %s3034_s2 = inlined_call_operand.vmem [shape: f32[1,384], index: 2, kind: input, shape index: {}]   ;;  %s3035_s3 = inlined_call_operand.hbm [shape: bf16[128,384], index: 3, kind: input, shape index: {}]   ;;  %s3036_s4 = inlined_call_operand.vmem [shape: f32[1,128], index: 4, kind: input, shape index: {}]   ;;  %s3037_s5 = inlined_call_operand.vmem [shape: f32[1,128], index: 5, kind: input, shape index: {}]   ;;  %s3038_s6 = inlined_call_operand.vmem [shape: f32[1,128], index: 6, kind: input, shape index: {}]   ;;  %s3039_s7 = inlined_call_operand.vmem [shape: f32[128,128], index: 7, kind: input, shape index: {}]   ;;  %s3040_s8 = inlined_call_operand.vmem [shape: f32[128,8], index: 8, kind: input, shape index: {}]   ;;  %s3041_s9 = inlined_call_operand.vmem [shape: f32[1,8], index: 9, kind: input, shape index: {}]   ;;  %s3042_s10 = inlined_call_operand.hbm [shape: f32[2,8], index: 10, kind: output, shape index: {}]  }
   0x1   :  { %16 = vsyncpa [#allocation6], 0 }
   0x2   :  { %17 = vsyncpa [#allocation4], 0  ;;  %s2383_s13 = smov [#allocation2]   ;;  %s2311_s17 = scalar_lea.hbm %s3033_s1, 1152 }
   0x3   :  { %s25_s14 = sshll.u32 %s2383_s13, 4  ;;  %p2312_p0 = scmp.ne.s32.totalorder %s3033_s1, %s2311_s17  ;;  %s26_s14 = int_to_ptr.vmem [resolvable:$true] %s25_s14 }
   0x4   :  { %p2315_p1 = scmp.lt.u32.totalorder %s2311_s17, %s3033_s1 }
   0x6   :  { %p2317_p2 = pnand %p2315_p1, %p2312_p0 }
   0x8   :  { %2320 = shalt.err (!%p2317_p2)
}
   0x9   :  { %s2321_s22 = scalar_lea.vmem %s26_s14, 1152  ;;  %p2326_p4 = scmp.lt.s32.totalorder %s26_s14, %s26_s14 }
   0xa   :  { %p2322_p3 = scmp.ne.s32.totalorder %s26_s14, %s2321_s22  ;;  %p2327_p5 = scmp.lt.s32.totalorder %s2321_s22, %s2321_s22 }
   0xc   :  { %p2328_p6 = por %p2327_p5, %p2326_p4 }
   0xe   :  { %p2329_p7 = pnand %p2328_p6, %p2322_p3 }
  0x10   :  { %2332 = shalt.err (!%p2329_p7)
}
  0x11   :  { %s2384_s23 = smov 192   ;;  %s2385_s24 = smov 12  }
  0x12   :  { %31 = dma.hbm_to_vmem [thread:$0]  %s3033_s1, 1152, %s26_s14, [#allocation3], %s2384_s23, %s2384_s23, %s2385_s24  }
  0x13   :  { %s2386_s27 = smov [#allocation5]   ;;  %s2333_s11 = scalar_lea.hbm %s3035_s3, 3072 }
  0x14   :  { %s39_s28 = sshll.u32 %s2386_s27, 4  ;;  %p2334_p8 = scmp.ne.s32.totalorder %s3035_s3, %s2333_s11  ;;  %s40_s28 = int_to_ptr.vmem [resolvable:$true] %s39_s28 }
  0x15   :  { %p2337_p9 = scmp.lt.u32.totalorder %s2333_s11, %s3035_s3 }
  0x17   :  { %p2339_p10 = pnand %p2337_p9, %p2334_p8 }
  0x19   :  { %2342 = shalt.err (!%p2339_p10)
}
  0x1a   :  { %s2343_s17 = scalar_lea.vmem %s40_s28, 3072  ;;  %p2348_p12 = scmp.lt.s32.totalorder %s40_s28, %s40_s28 }
  0x1b   :  { %p2344_p11 = scmp.ne.s32.totalorder %s40_s28, %s2343_s17  ;;  %p2349_p13 = scmp.lt.s32.totalorder %s2343_s17, %s2343_s17 }
  0x1d   :  { %p2350_p0 = por %p2349_p13, %p2348_p12 }
  0x1f   :  { %p2351_p1 = pnand %p2350_p0, %p2344_p11 }
  0x21   :  { %2354 = shalt.err (!%p2351_p1)
}
  0x22   :  { %45 = dma.hbm_to_vmem [thread:$0]  %s3035_s3, 3072, %s40_s28, [#allocation6], %s2384_s23, %s2384_s23, %s2385_s24  }
  0x23   :  { %2377 = dma.done.wait [#allocation3], 1152  }
  0x24   :  { %2378 = vsyncadd [#allocation3], 4294966144 }
  0x25   :  { %2379 = dma.done.wait [#allocation6], 3072  }
  0x26   :  { %2380 = vsyncadd [#allocation6], 4294964224  ;;  %v2387_v0 = vmov 0   ;;  %v2167_v1 = vld [vmem:[#allocation2 + $0x4] ss:$12 sps:$4 sm:$0xff]   ;;  %vm149_vm0 = vcmask 392192   ;;  %v81_v36 = vlaneseq }
  0x27   :  { %185 = vmatprep.mubr.bf16.mxu1 %v2387_v0  ;;  %430 = vmatprep.mubr.bf16.mxu0 %v2387_v0  ;;  %v2473_v2 = vld [vmem:[#allocation5 + $0x4] ss:$12 sps:$4 sm:$0xff]   ;;  %v2475_v4 = vld [vmem:[#allocation5] ss:$12 sps:$4 sm:$0xff]   ;;  %v2479_v6 = vld [vmem:[#allocation5 + $0x1c] ss:$12 sps:$4 sm:$0xff]  }
  0x28   :  { %153 = vmatprep.subr.bf16.mxu1 %v2167_v1  ;;  %v2171_v3 = vld [vmem:[#allocation2] ss:$12 sps:$4 sm:$0xff]   ;;  %398 = vmatprep.subr.bf16.mxu0 %v2473_v2  ;;  %v2173_v5 = vld [vmem:[#allocation2 + $0x1c] ss:$12 sps:$4 sm:$0xff]   ;;  %v2177_v7 = vld [vmem:[#allocation2 + $0x18] ss:$12 sps:$4 sm:$0xff]  }
  0x29   :  { %154 = vmatpush1.bf16.msra.mxu1 %v2171_v3  ;;  %399 = vmatpush1.bf16.msra.mxu0 %v2475_v4  ;;  %v2481_v8 = vld [vmem:[#allocation5 + $0x18] ss:$12 sps:$4 sm:$0xff]   ;;  %v2484_v10 = vld [vmem:[#allocation5 + $0x34] ss:$12 sps:$4 sm:$0xff]   ;;  %v2487_v12 = vld [vmem:[#allocation5 + $0x30] ss:$12 sps:$4 sm:$0xff]  }
  0x2a   :  { %155 = vmatprep.subr.bf16.mxu1 %v2173_v5  ;;  %400 = vmatprep.subr.bf16.mxu0 %v2479_v6  ;;  %v2179_v9 = vld [vmem:[#allocation2 + $0x34] ss:$12 sps:$4 sm:$0xff]   ;;  %v2183_v11 = vld [vmem:[#allocation2 + $0x30] ss:$12 sps:$4 sm:$0xff]   ;;  %v2388_v17 = vmov 0.0   ;;  %vm2389_vm1 = vmmov 0  }
  0x2b   :  { %v2490_v13 = vld [vmem:[#allocation5 + $0x4c] ss:$12 sps:$4 sm:$0xff]   ;;  %v2496_v16 = vld [vmem:[#allocation5 + $0x48] ss:$12 sps:$4 sm:$0xff]   ;;  %v2500_v18 = vld [vmem:[#allocation5 + $0x64] ss:$12 sps:$4 sm:$0xff]  }
  0x2c   :  { %v2185_v14 = vld [vmem:[%s3032_s0] sm:$0xff]   ;;  %v2188_v15 = vld [vmem:[#allocation2 + $0x8] ss:$12 sps:$4 sm:$0xff]   ;;  %v2522_v26 = vld [vmem:[#allocation5 + $0x8] ss:$12 sps:$4 sm:$0xff]   ;;  %v82_v37 = vshrl.u32 %v81_v36, 7 }
  0x2d   :  { %156 = vmatpush1.bf16.msra.mxu1 %v2177_v7  ;;  %401 = vmatpush1.bf16.msra.mxu0 %v2481_v8  ;;  %v2192_v19 = vld [vmem:[#allocation2 + $0x20] ss:$12 sps:$4 sm:$0xff]   ;;  %v2504_v20 = vld [vmem:[#allocation5 + $0x60] ss:$12 sps:$4 sm:$0xff]   ;;  %v2508_v21 = vld [vmem:[#allocation5 + $0x7c] ss:$12 sps:$4 sm:$0xff]  }
  0x2e   :  { %157 = vmatprep.subr.bf16.mxu1 %v2179_v9  ;;  %402 = vmatprep.subr.bf16.mxu0 %v2484_v10  ;;  %v2196_v22 = vld [vmem:[#allocation2 + $0x38] ss:$12 sps:$4 sm:$0xff]   ;;  %v2513_v23 = vld [vmem:[#allocation5 + $0x78] ss:$12 sps:$4 sm:$0xff]   ;;  %v2517_v24 = vld [vmem:[#allocation5 + $0x94] ss:$12 sps:$4 sm:$0xff]  }
  0x2f   :  { %v2519_v25 = vld [vmem:[#allocation5 + $0x90] ss:$12 sps:$4 sm:$0xff]   ;;  %v2526_v27 = vld [vmem:[#allocation5 + $0xac] ss:$12 sps:$4 sm:$0xff]   ;;  %v2531_v28 = vld [vmem:[#allocation5 + $0xa8] ss:$12 sps:$4 sm:$0xff]  }
  0x30   :  { %v2533_v29 = vld [vmem:[#allocation5 + $0x20] ss:$12 sps:$4 sm:$0xff]   ;;  %v2541_v30 = vld [vmem:[#allocation5 + $0x38] ss:$12 sps:$4 sm:$0xff]   ;;  %v2547_v31 = vld [vmem:[#allocation5 + $0x50] ss:$12 sps:$4 sm:$0xff]  }
  0x31   :  { %158 = vmatpush1.bf16.msra.mxu1 %v2183_v11  ;;  %403 = vmatpush1.bf16.msra.mxu0 %v2487_v12  ;;  %v2554_v32 = vld [vmem:[#allocation5 + $0x68] ss:$12 sps:$4 sm:$0xff]   ;;  %v2560_v33 = vld [vmem:[#allocation5 + $0x80] ss:$12 sps:$4 sm:$0xff]   ;;  %v2566_v34 = vld [vmem:[#allocation5 + $0x98] ss:$12 sps:$4 sm:$0xff]  }
  0x32   :  { %1811 = vmatprep.subr.bf16.mxu1 %v2388_v17  ;;  %404 = vmatprep.subr.bf16.mxu0 %v2490_v13  ;;  %v2572_v35 = vld [vmem:[#allocation5 + $0xb0] ss:$12 sps:$4 sm:$0xff]   ;;  %v83_v38 = vsub.s32 0, %v82_v37  ;;  %v79_v39 = vld [vmem:[%s3034_s2] sm:$0x7]  ;;  %v87_v40 = vsub.s32 1, %v82_v37 }
  0x33   :  { %v91_v49 = vsub.s32 2, %v82_v37  ;;  %v2622_v11 = vld [vmem:[%s3036_s4] ss:$0 sm:$0xff]  ;;  %s2391_s18 = smov [#allocation7]   ;;  %vm1610_vm2 = vcmask 58368  }
  0x34   :  { %1638 = vmatmul.mubr.msk.bf16.vlgmr.msra.gmra.mrb[0].mxu1 %vm149_vm0, %v2185_v14  ;;  %v84_v41 = vrot.slane %v79_v39, %v83_v38  ;;  %v88_v43 = vrot.slane %v79_v39, %v87_v40  ;;  %s1618_s0 = sshll.u32 %s2391_s18, 4  ;;  %s1619_s0 = int_to_ptr.vmem [resolvable:$true] %s1618_s0 }
  0x35   :  { %1812 = vmatpush3.bf16.msra.mxu1 %v2188_v15  ;;  %405 = vmatpush1.bf16.msra.mxu0 %v2496_v16  ;;  %v92_v50 = vrot.slane %v79_v39, %v91_v49  ;;  %p2360_p3 = scmp.lt.s32.totalorder %s1619_s0, %s1619_s0 }
  0x36   :  { %1813 = vmatprep.subr.bf16.mxu1 %v2388_v17  ;;  %406 = vmatprep.subr.bf16.mxu0 %v2500_v18 }
  0x37   :  { %1817 = vmatprep.mubr.msk.bf16.mxu1 %vm2389_vm1, %v2388_v17 }
  0x39   :  { %1814 = vmatpush3.bf16.msra.mxu1 %v2192_v19  ;;  %407 = vmatpush1.bf16.msra.mxu0 %v2504_v20 }
  0x3a   :  { %1815 = vmatprep.subr.bf16.mxu1 %v2388_v17  ;;  %408 = vmatprep.subr.bf16.mxu0 %v2508_v21 }
  0x3d   :  { %1816 = vmatpush3.bf16.msra.mxu1 %v2196_v22  ;;  %409 = vmatpush1.bf16.msra.mxu0 %v2513_v23 }
  0x3e   :  { %410 = vmatprep.subr.bf16.mxu0 %v2517_v24  ;;  %1821 = vmatprep.subr.bf16.mxu1 %v2388_v17 }
  0x40   :  { %1818 = vmatmul.mubr.msk.bf16.vlgmr.msra.gmra.mrb[4].mxu1 %vm149_vm0, %v2185_v14 }
  0x41   :  { %411 = vmatpush1.bf16.msra.mxu0 %v2519_v25  ;;  %1822 = vmatpush3.bf16.msra.mxu1 %v2522_v26 }
  0x42   :  { %412 = vmatprep.subr.bf16.mxu0 %v2526_v27  ;;  %1823 = vmatprep.subr.bf16.mxu1 %v2388_v17 }
  0x43   :  { %1837 = vmatprep.mubr.msk.bf16.mxu1 %vm2389_vm1, %v2388_v17 }
  0x45   :  { %413 = vmatpush1.bf16.msra.mxu0 %v2531_v28  ;;  %1824 = vmatpush3.bf16.msra.mxu1 %v2533_v29 }
  0x46   :  { %1825 = vmatprep.subr.bf16.mxu1 %v2388_v17  ;;  %508 = vmatprep.subr.bf16.mxu0 %v2473_v2 }
  0x48   :  { %431 = vmatmul.mubr.bf16.vlgmr.msra.gmra.mrb[0].mxu0 %v2387_v0 }
  0x49   :  { %1826 = vmatpush3.bf16.msra.mxu1 %v2541_v30  ;;  %509 = vmatpush1.bf16.msra.mxu0 %v2475_v4 }
  0x4a   :  { %1827 = vmatprep.subr.bf16.mxu1 %v2388_v17  ;;  %510 = vmatprep.subr.bf16.mxu0 %v2479_v6 }
  0x4b   :  { %540 = vmatprep.mubr.bf16.mxu0 %v2387_v0 }
  0x4d   :  { %1828 = vmatpush3.bf16.msra.mxu1 %v2547_v31  ;;  %511 = vmatpush1.bf16.msra.mxu0 %v2481_v8 }
  0x4e   :  { %1829 = vmatprep.subr.bf16.mxu1 %v2388_v17  ;;  %512 = vmatprep.subr.bf16.mxu0 %v2484_v10 }
  0x51   :  { %1830 = vmatpush3.bf16.msra.mxu1 %v2554_v32  ;;  %513 = vmatpush1.bf16.msra.mxu0 %v2487_v12 }
  0x52   :  { %1831 = vmatprep.subr.bf16.mxu1 %v2388_v17  ;;  %514 = vmatprep.subr.bf16.mxu0 %v2490_v13 }
  0x55   :  { %1832 = vmatpush3.bf16.msra.mxu1 %v2560_v33  ;;  %515 = vmatpush1.bf16.msra.mxu0 %v2496_v16 }
  0x56   :  { %1833 = vmatprep.subr.bf16.mxu1 %v2388_v17  ;;  %516 = vmatprep.subr.bf16.mxu0 %v2500_v18 }
  0x59   :  { %1834 = vmatpush3.bf16.msra.mxu1 %v2566_v34  ;;  %517 = vmatpush1.bf16.msra.mxu0 %v2504_v20 }
  0x5a   :  { %1835 = vmatprep.subr.bf16.mxu1 %v2388_v17  ;;  %518 = vmatprep.subr.bf16.mxu0 %v2508_v21 }
  0x5d   :  { %1836 = vmatpush3.bf16.msra.mxu1 %v2572_v35  ;;  %519 = vmatpush1.bf16.msra.mxu0 %v2513_v23 }
  0x5e   :  { %1841 = vmatprep.subr.bf16.mxu1 %v2388_v17  ;;  %520 = vmatprep.subr.bf16.mxu0 %v2517_v24 }
  0x60   :  { %1838 = vmatmul.mubr.bf16.vlgmr.msra.gmra.mrb[8].mxu1 %v2387_v0 }
  0x61   :  { %1842 = vmatpush3.bf16.msra.mxu1 %v2522_v26  ;;  %521 = vmatpush1.bf16.msra.mxu0 %v2519_v25 }
  0x62   :  { %1843 = vmatprep.subr.bf16.mxu1 %v2388_v17  ;;  %522 = vmatprep.subr.bf16.mxu0 %v2526_v27 }
  0x63   :  { %1857 = vmatprep.mubr.msk.bf16.mxu1 %vm2389_vm1, %v2388_v17 }
  0x65   :  { %1844 = vmatpush3.bf16.msra.mxu1 %v2533_v29  ;;  %523 = vmatpush1.bf16.msra.mxu0 %v2531_v28 }
  0x66   :  { %1845 = vmatprep.subr.bf16.mxu1 %v2388_v17  ;;  %627 = vmatprep.subr.bf16.mxu0 %v2473_v2 }
  0x69   :  { %1846 = vmatpush3.bf16.msra.mxu1 %v2541_v30 }
  0x6a   :  { %1847 = vmatprep.subr.bf16.mxu1 %v2388_v17 }
  0x6d   :  { %1848 = vmatpush3.bf16.msra.mxu1 %v2547_v31 }
  0x6e   :  { %1849 = vmatprep.subr.bf16.mxu1 %v2388_v17 }
  0x71   :  { %1850 = vmatpush3.bf16.msra.mxu1 %v2554_v32 }
  0x72   :  { %1851 = vmatprep.subr.bf16.mxu1 %v2388_v17 }
  0x75   :  { %1852 = vmatpush3.bf16.msra.mxu1 %v2560_v33 }
  0x76   :  { %1853 = vmatprep.subr.bf16.mxu1 %v2388_v17 }
  0x79   :  { %1854 = vmatpush3.bf16.msra.mxu1 %v2566_v34 }
  0x7a   :  { %1855 = vmatprep.subr.bf16.mxu1 %v2388_v17 }
  0x7d   :  { %1856 = vmatpush3.bf16.msra.mxu1 %v2572_v35 }
  0x7e   :  { %1861 = vmatprep.subr.bf16.mxu1 %v2388_v17 }
 0x107   :  { %v187_v42 = vpop.f32.mrb[0].mxu1 }
 0x108   :  { %v189_v44 = vpop.f32.mrb[1].mxu1  ;;  %v2613_v56 = vadd.f32 %v187_v42, %v84_v41 }
 0x109   :  { %v191_v45 = vpop.f32.mrb[2].mxu1  ;;  %v2616_v60 = vadd.f32 %v189_v44, %v88_v43 }
 0x10a   :  { %v2607_v46 = vadd.f32 %v191_v45, %v84_v41  ;;  %v193_v47 = vpop.f32.mrb[3].mxu1 }
 0x10b   :  { %v2609_v48 = vadd.f32 %v193_v47, %v88_v43 }
 0x113   :  { %v230_v51 = vpop.f32.mrb[4].mxu1 }
 0x114   :  { %v1819_v52 = vpop.f32.mrb[5].mxu1  ;;  %v2625_v39 = vadd.f32 %v230_v51, %v92_v50 }
 0x115   :  { %v233_v53 = vpop.f32.mrb[6].mxu1 }
 0x116   :  { %v2611_v54 = vadd.f32 %v233_v53, %v92_v50  ;;  %v1820_v55 = vpop.f32.mrb[7].mxu1 }
 0x11b   :  { %v432_v57 = vpop.f32.mrb[0].mxu0 }
 0x11c   :  { %v479_v58 = vadd.f32 %v432_v57, %v2613_v56  ;;  %v434_v59 = vpop.f32.mrb[1].mxu0 }
 0x11d   :  { %v436_v61 = vpop.f32.mrb[2].mxu0  ;;  %v486_v1 = vadd.f32 %v434_v59, %v2616_v60 }
 0x11e   :  { %v1664_v62 = vmul.f32 -1.442695, %v479_v58  ;;  %v437_v63 = vpop.f32.mrb[3].mxu0 }
 0x11f   :  { %v1665_v3 = vmul.f32 -1.442695, %v486_v1 }
 0x120   :  { %2212 = vpow2.f32 %v1664_v62 }
 0x121   :  { %2214 = vpow2.f32 %v1665_v3 }
 0x12a   :  { %v2213_v5 = vpop.eup %2212 }
 0x12b   :  { %v483_v7 = vadd.f32 1.0, %v2213_v5  ;;  %v2215_v9 = vpop.eup %2214 }
 0x12c   :  { %v490_v15 = vadd.f32 1.0, %v2215_v9 }
 0x12d   :  { %2216 = vrcp.f32 %v483_v7 }
 0x12e   :  { %2218 = vrcp.f32 %v490_v15 }
 0x133   :  { %v473_v14 = vpop.f32.mrb[8].mxu1 }
 0x134   :  { %v499_v19 = vadd.f32 %v2622_v11, %v473_v14  ;;  %v1839_v22 = vpop.f32.mrb[9].mxu1 }
 0x135   :  { %v476_v36 = vpop.f32.mrb[10].mxu1 }
 0x136   :  { %v1840_v37 = vpop.f32.mrb[11].mxu1 }
 0x137   :  { %v2217_v38 = vpop.eup %2216 }
 0x138   :  { %v500_v40 = vmul.f32 %v2217_v38, %v499_v19  ;;  %v2219_v42 = vpop.eup %2218 }
 0x139   :  { %v503_v43 = vsub.f32 1.0, %v2219_v42  ;;  %v505_v47 = vmul.f32 0.0, %v2219_v42 }
 0x13a   :  { %v501_v41 = vadd.f32 %v500_v40, %v2625_v39 }
 0x13c   :  { %2220 = vtanh.f32 %v501_v41 }
 0x146   :  { %v2221_v44 = vpop.eup %2220 }
 0x147   :  { %v504_v45 = vmul.f32 %v2221_v44, %v503_v43 }
 0x149   :  { %v2628_v49 = vadd.f32 %v505_v47, %v504_v45 }
 0x14b   :  { %v507_v52 = vpack.c.bf16 %v2628_v49, %v2628_v49  ;;  %v619_v38 = vrot.slane %v2628_v49, 6 }
 0x14d   :  { %541 = vmatmul.mubr.bf16.vlgmr.msra.gmra.mrb[4].mxu0 %v507_v52  ;;  %1858 = vmatmul.mubr.bf16.vlgmr.msra.gmra.mrb[12].mxu1 %v507_v52 }
 0x14e   :  { %628 = vmatpush1.bf16.msra.mxu0 %v2475_v4  ;;  %1862 = vmatpush3.bf16.msra.mxu1 %v2522_v26 }
 0x14f   :  { %629 = vmatprep.subr.bf16.mxu0 %v2479_v6  ;;  %1863 = vmatprep.subr.bf16.mxu1 %v2388_v17 }
 0x150   :  { %659 = vmatprep.mubr.bf16.mxu0 %v2387_v0  ;;  %1877 = vmatprep.mubr.msk.bf16.mxu1 %vm2389_vm1, %v2388_v17 }
 0x152   :  { %630 = vmatpush1.bf16.msra.mxu0 %v2481_v8  ;;  %1864 = vmatpush3.bf16.msra.mxu1 %v2533_v29 }
 0x153   :  { %631 = vmatprep.subr.bf16.mxu0 %v2484_v10  ;;  %1865 = vmatprep.subr.bf16.mxu1 %v2388_v17 }
 0x156   :  { %632 = vmatpush1.bf16.msra.mxu0 %v2487_v12  ;;  %1866 = vmatpush3.bf16.msra.mxu1 %v2541_v30 }
 0x157   :  { %633 = vmatprep.subr.bf16.mxu0 %v2490_v13  ;;  %1867 = vmatprep.subr.bf16.mxu1 %v2388_v17 }
 0x15a   :  { %634 = vmatpush1.bf16.msra.mxu0 %v2496_v16  ;;  %1868 = vmatpush3.bf16.msra.mxu1 %v2547_v31 }
 0x15b   :  { %635 = vmatprep.subr.bf16.mxu0 %v2500_v18  ;;  %1869 = vmatprep.subr.bf16.mxu1 %v2388_v17 }
 0x15e   :  { %636 = vmatpush1.bf16.msra.mxu0 %v2504_v20  ;;  %1870 = vmatpush3.bf16.msra.mxu1 %v2554_v32 }
 0x15f   :  { %637 = vmatprep.subr.bf16.mxu0 %v2508_v21  ;;  %1871 = vmatprep.subr.bf16.mxu1 %v2388_v17 }
 0x162   :  { %638 = vmatpush1.bf16.msra.mxu0 %v2513_v23  ;;  %1872 = vmatpush3.bf16.msra.mxu1 %v2560_v33 }
 0x163   :  { %639 = vmatprep.subr.bf16.mxu0 %v2517_v24  ;;  %1873 = vmatprep.subr.bf16.mxu1 %v2388_v17 }
 0x166   :  { %640 = vmatpush1.bf16.msra.mxu0 %v2519_v25  ;;  %1874 = vmatpush3.bf16.msra.mxu1 %v2566_v34 }
 0x167   :  { %641 = vmatprep.subr.bf16.mxu0 %v2526_v27  ;;  %1875 = vmatprep.subr.bf16.mxu1 %v2388_v17 }
 0x16a   :  { %642 = vmatpush1.bf16.msra.mxu0 %v2531_v28  ;;  %1876 = vmatpush3.bf16.msra.mxu1 %v2572_v35 }
 0x16b   :  { %746 = vmatprep.subr.bf16.mxu0 %v2473_v2  ;;  %1881 = vmatprep.subr.bf16.mxu1 %v2388_v17 }
 0x220   :  { %v542_v50 = vpop.f32.mrb[4].mxu0  ;;  %v583_v51 = vpop.f32.mrb[12].mxu1 }
 0x221   :  { %v590_v53 = vrot.slane %v542_v50, 6  ;;  %v544_v55 = vpop.f32.mrb[5].mxu0  ;;  %v1859_v57 = vpop.f32.mrb[13].mxu1  ;;  %v609_v22 = vadd.f32 %v2622_v11, %v583_v51 }
 0x222   :  { %v600_v58 = vrot.slane %v544_v55, 6  ;;  %v546_v59 = vpop.f32.mrb[6].mxu0  ;;  %v586_v61 = vpop.f32.mrb[14].mxu1 }
 0x223   :  { %v592_v62 = vadd.f32 %v590_v53, %v2613_v56  ;;  %v547_v63 = vpop.f32.mrb[7].mxu0  ;;  %v1860_v1 = vpop.f32.mrb[15].mxu1  ;;  %v611_v36 = vrot.slane %v609_v22, 6 }
 0x224   :  { %v602_v3 = vadd.f32 %v600_v58, %v2616_v60 }
 0x225   :  { %v1667_v5 = vmul.f32 -1.442695, %v592_v62 }
 0x226   :  { %v1668_v7 = vmul.f32 -1.442695, %v602_v3 }
 0x227   :  { %2222 = vpow2.f32 %v1667_v5 }
 0x228   :  { %2224 = vpow2.f32 %v1668_v7 }
 0x231   :  { %v2223_v9 = vpop.eup %2222 }
 0x232   :  { %v2225_v14 = vpop.eup %2224  ;;  %v596_v15 = vadd.f32 1.0, %v2223_v9 }
 0x233   :  { %v606_v19 = vadd.f32 1.0, %v2225_v14 }
 0x234   :  { %2226 = vrcp.f32 %v596_v15 }
 0x235   :  { %2228 = vrcp.f32 %v606_v19 }
 0x23e   :  { %v2227_v37 = vpop.eup %2226 }
 0x23f   :  { %v2229_v40 = vpop.eup %2228  ;;  %v613_v41 = vmul.f32 %v2227_v37, %v611_v36 }
 0x240   :  { %v621_v42 = vmul.f32 %v2229_v40, %v619_v38  ;;  %v616_v44 = vsub.f32 1.0, %v2229_v40 }
 0x241   :  { %v614_v43 = vadd.f32 %v613_v41, %v2625_v39 }
 0x243   :  { %2230 = vtanh.f32 %v614_v43 }
 0x24d   :  { %v2231_v45 = vpop.eup %2230 }
 0x24e   :  { %v617_v47 = vmul.f32 %v2231_v45, %v616_v44 }
 0x250   :  { %v2672_v52 = vadd.f32 %v621_v42, %v617_v47 }
 0x252   :  { %v623_v50 = vpack.c.bf16 %v2672_v52, %v2672_v52  ;;  %v738_v40 = vrot.slane %v2672_v52, 6 }
 0x254   :  { %v625_v53 = vrot.slane %v623_v50, 1 }
 0x256   :  { %660 = vmatmul.mubr.bf16.vlgmr.msra.gmra.mrb[8].mxu0 %v625_v53  ;;  %1878 = vmatmul.mubr.bf16.vlgmr.msra.gmra.mrb[16].mxu1 %v625_v53 }
 0x257   :  { %747 = vmatpush1.bf16.msra.mxu0 %v2475_v4  ;;  %1882 = vmatpush3.bf16.msra.mxu1 %v2522_v26 }
 0x258   :  { %748 = vmatprep.subr.bf16.mxu0 %v2479_v6  ;;  %1883 = vmatprep.subr.bf16.mxu1 %v2388_v17 }
 0x259   :  { %778 = vmatprep.mubr.bf16.mxu0 %v2387_v0  ;;  %1897 = vmatprep.mubr.msk.bf16.mxu1 %vm2389_vm1, %v2388_v17 }
 0x25b   :  { %749 = vmatpush1.bf16.msra.mxu0 %v2481_v8  ;;  %1884 = vmatpush3.bf16.msra.mxu1 %v2533_v29 }
 0x25c   :  { %750 = vmatprep.subr.bf16.mxu0 %v2484_v10  ;;  %1885 = vmatprep.subr.bf16.mxu1 %v2388_v17 }
 0x25f   :  { %751 = vmatpush1.bf16.msra.mxu0 %v2487_v12  ;;  %1886 = vmatpush3.bf16.msra.mxu1 %v2541_v30 }
 0x260   :  { %752 = vmatprep.subr.bf16.mxu0 %v2490_v13  ;;  %1887 = vmatprep.subr.bf16.mxu1 %v2388_v17 }
 0x263   :  { %753 = vmatpush1.bf16.msra.mxu0 %v2496_v16  ;;  %1888 = vmatpush3.bf16.msra.mxu1 %v2547_v31 }
 0x264   :  { %754 = vmatprep.subr.bf16.mxu0 %v2500_v18  ;;  %1889 = vmatprep.subr.bf16.mxu1 %v2388_v17 }
 0x267   :  { %755 = vmatpush1.bf16.msra.mxu0 %v2504_v20  ;;  %1890 = vmatpush3.bf16.msra.mxu1 %v2554_v32 }
 0x268   :  { %756 = vmatprep.subr.bf16.mxu0 %v2508_v21  ;;  %1891 = vmatprep.subr.bf16.mxu1 %v2388_v17 }
 0x26b   :  { %757 = vmatpush1.bf16.msra.mxu0 %v2513_v23  ;;  %1892 = vmatpush3.bf16.msra.mxu1 %v2560_v33 }
 0x26c   :  { %758 = vmatprep.subr.bf16.mxu0 %v2517_v24  ;;  %1893 = vmatprep.subr.bf16.mxu1 %v2388_v17 }
 0x26f   :  { %759 = vmatpush1.bf16.msra.mxu0 %v2519_v25  ;;  %1894 = vmatpush3.bf16.msra.mxu1 %v2566_v34 }
 0x270   :  { %760 = vmatprep.subr.bf16.mxu0 %v2526_v27  ;;  %1895 = vmatprep.subr.bf16.mxu1 %v2388_v17 }
 0x273   :  { %761 = vmatpush1.bf16.msra.mxu0 %v2531_v28  ;;  %1896 = vmatpush3.bf16.msra.mxu1 %v2572_v35 }
 0x274   :  { %865 = vmatprep.subr.bf16.mxu0 %v2473_v2  ;;  %1901 = vmatprep.subr.bf16.mxu1 %v2388_v17 }
 0x329   :  { %v661_v49 = vpop.f32.mrb[8].mxu0  ;;  %v702_v51 = vpop.f32.mrb[16].mxu1 }
 0x32a   :  { %v709_v55 = vrot.slane %v661_v49, 4  ;;  %v663_v57 = vpop.f32.mrb[9].mxu0  ;;  %v1879_v58 = vpop.f32.mrb[17].mxu1  ;;  %v728_v36 = vadd.f32 %v2622_v11, %v702_v51 }
 0x32b   :  { %v719_v59 = vrot.slane %v663_v57, 4  ;;  %v665_v61 = vpop.f32.mrb[10].mxu0  ;;  %v705_v62 = vpop.f32.mrb[18].mxu1 }
 0x32c   :  { %v711_v63 = vadd.f32 %v709_v55, %v2613_v56  ;;  %v666_v1 = vpop.f32.mrb[11].mxu0  ;;  %v1880_v3 = vpop.f32.mrb[19].mxu1  ;;  %v730_v37 = vrot.slane %v728_v36, 4 }
 0x32d   :  { %v721_v5 = vadd.f32 %v719_v59, %v2616_v60 }
 0x32e   :  { %v1669_v7 = vmul.f32 -1.442695, %v711_v63 }
 0x32f   :  { %v1670_v9 = vmul.f32 -1.442695, %v721_v5 }
 0x330   :  { %2232 = vpow2.f32 %v1669_v7 }
 0x331   :  { %2234 = vpow2.f32 %v1670_v9 }
 0x33a   :  { %v2233_v14 = vpop.eup %2232 }
 0x33b   :  { %v2235_v15 = vpop.eup %2234  ;;  %v715_v19 = vadd.f32 1.0, %v2233_v14 }
 0x33c   :  { %v725_v22 = vadd.f32 1.0, %v2235_v15 }
 0x33d   :  { %2236 = vrcp.f32 %v715_v19 }
 0x33e   :  { %2238 = vrcp.f32 %v725_v22 }
 0x347   :  { %v2237_v38 = vpop.eup %2236 }
 0x348   :  { %v2239_v41 = vpop.eup %2238  ;;  %v732_v42 = vmul.f32 %v2237_v38, %v730_v37 }
 0x349   :  { %v740_v43 = vmul.f32 %v2239_v41, %v738_v40  ;;  %v735_v45 = vsub.f32 1.0, %v2239_v41 }
 0x34a   :  { %v733_v44 = vadd.f32 %v732_v42, %v2625_v39 }
 0x34c   :  { %2240 = vtanh.f32 %v733_v44 }
 0x356   :  { %v2241_v47 = vpop.eup %2240 }
 0x357   :  { %v736_v50 = vmul.f32 %v2241_v47, %v735_v45 }
 0x359   :  { %v2716_v53 = vadd.f32 %v740_v43, %v736_v50 }
 0x35b   :  { %v742_v49 = vpack.c.bf16 %v2716_v53, %v2716_v53 }
 0x35d   :  { %v744_v55 = vrot.slane %v742_v49, 2 }
 0x35f   :  { %779 = vmatmul.mubr.bf16.vlgmr.msra.gmra.mrb[12].mxu0 %v744_v55  ;;  %1898 = vmatmul.mubr.bf16.vlgmr.msra.gmra.mrb[20].mxu1 %v744_v55 }
 0x360   :  { %866 = vmatpush1.bf16.msra.mxu0 %v2475_v4  ;;  %1902 = vmatpush3.bf16.msra.mxu1 %v2522_v26 }
 0x361   :  { %867 = vmatprep.subr.bf16.mxu0 %v2479_v6  ;;  %1903 = vmatprep.subr.bf16.mxu1 %v2388_v17 }
 0x362   :  { %897 = vmatprep.mubr.bf16.mxu0 %v2387_v0  ;;  %1917 = vmatprep.mubr.msk.bf16.mxu1 %vm2389_vm1, %v2388_v17 }
 0x364   :  { %868 = vmatpush1.bf16.msra.mxu0 %v2481_v8  ;;  %1904 = vmatpush3.bf16.msra.mxu1 %v2533_v29 }
 0x365   :  { %869 = vmatprep.subr.bf16.mxu0 %v2484_v10  ;;  %1905 = vmatprep.subr.bf16.mxu1 %v2388_v17 }
 0x368   :  { %870 = vmatpush1.bf16.msra.mxu0 %v2487_v12  ;;  %1906 = vmatpush3.bf16.msra.mxu1 %v2541_v30 }
 0x369   :  { %871 = vmatprep.subr.bf16.mxu0 %v2490_v13  ;;  %1907 = vmatprep.subr.bf16.mxu1 %v2388_v17 }
 0x36c   :  { %872 = vmatpush1.bf16.msra.mxu0 %v2496_v16  ;;  %1908 = vmatpush3.bf16.msra.mxu1 %v2547_v31 }
 0x36d   :  { %873 = vmatprep.subr.bf16.mxu0 %v2500_v18  ;;  %1909 = vmatprep.subr.bf16.mxu1 %v2388_v17 }
 0x370   :  { %874 = vmatpush1.bf16.msra.mxu0 %v2504_v20  ;;  %1910 = vmatpush3.bf16.msra.mxu1 %v2554_v32 }
 0x371   :  { %875 = vmatprep.subr.bf16.mxu0 %v2508_v21  ;;  %1911 = vmatprep.subr.bf16.mxu1 %v2388_v17 }
 0x374   :  { %876 = vmatpush1.bf16.msra.mxu0 %v2513_v23  ;;  %1912 = vmatpush3.bf16.msra.mxu1 %v2560_v33 }
 0x375   :  { %877 = vmatprep.subr.bf16.mxu0 %v2517_v24  ;;  %1913 = vmatprep.subr.bf16.mxu1 %v2388_v17 }
 0x378   :  { %878 = vmatpush1.bf16.msra.mxu0 %v2519_v25  ;;  %1914 = vmatpush3.bf16.msra.mxu1 %v2566_v34 }
 0x379   :  { %879 = vmatprep.subr.bf16.mxu0 %v2526_v27  ;;  %1915 = vmatprep.subr.bf16.mxu1 %v2388_v17 }
 0x37c   :  { %880 = vmatpush1.bf16.msra.mxu0 %v2531_v28  ;;  %1916 = vmatpush3.bf16.msra.mxu1 %v2572_v35 }
 0x37d   :  { %972 = vmatprep.subr.bf16.mxu0 %v2473_v2  ;;  %1921 = vmatprep.subr.bf16.mxu1 %v2388_v17 }
 0x432   :  { %v780_v52 = vpop.f32.mrb[12].mxu0  ;;  %v821_v51 = vpop.f32.mrb[20].mxu1 }
 0x433   :  { %v828_v57 = vrot.slane %v780_v52, 2  ;;  %v782_v58 = vpop.f32.mrb[13].mxu0  ;;  %v1899_v59 = vpop.f32.mrb[21].mxu1  ;;  %v847_v37 = vadd.f32 %v2622_v11, %v821_v51 }
 0x434   :  { %v838_v61 = vrot.slane %v782_v58, 2  ;;  %v784_v62 = vpop.f32.mrb[14].mxu0  ;;  %v824_v63 = vpop.f32.mrb[22].mxu1 }
 0x435   :  { %v830_v1 = vadd.f32 %v828_v57, %v2613_v56  ;;  %v785_v3 = vpop.f32.mrb[15].mxu0  ;;  %v1900_v5 = vpop.f32.mrb[23].mxu1  ;;  %v849_v38 = vrot.slane %v847_v37, 2  ;;  %v857_v56 = vrot.slane %v2716_v53, 6 }
 0x436   :  { %v840_v7 = vadd.f32 %v838_v61, %v2616_v60 }
 0x437   :  { %v1671_v9 = vmul.f32 -1.442695, %v830_v1 }
 0x438   :  { %v1672_v14 = vmul.f32 -1.442695, %v840_v7 }
 0x439   :  { %2242 = vpow2.f32 %v1671_v9 }
 0x43a   :  { %2244 = vpow2.f32 %v1672_v14 }
 0x443   :  { %v2243_v15 = vpop.eup %2242 }
 0x444   :  { %v2245_v19 = vpop.eup %2244  ;;  %v834_v22 = vadd.f32 1.0, %v2243_v15 }
 0x445   :  { %v844_v36 = vadd.f32 1.0, %v2245_v19 }
 0x446   :  { %2246 = vrcp.f32 %v834_v22 }
 0x447   :  { %2248 = vrcp.f32 %v844_v36 }
 0x450   :  { %v2247_v40 = vpop.eup %2246 }
 0x451   :  { %v2249_v41 = vpop.eup %2248  ;;  %v851_v42 = vmul.f32 %v2247_v40, %v849_v38 }
 0x452   :  { %v859_v43 = vmul.f32 %v2249_v41, %v857_v56  ;;  %v854_v44 = vsub.f32 1.0, %v2249_v41 }
 0x453   :  { %v852_v60 = vadd.f32 %v851_v42, %v2625_v39 }
 0x455   :  { %2250 = vtanh.f32 %v852_v60 }
 0x45f   :  { %v2251_v45 = vpop.eup %2250 }
 0x460   :  { %v855_v47 = vmul.f32 %v2251_v45, %v854_v44 }
 0x462   :  { %v2760_v50 = vadd.f32 %v859_v43, %v855_v47 }
 0x464   :  { %v861_v49 = vpack.c.bf16 %v2760_v50, %v2760_v50  ;;  %v967_v19 = vrot.slane %v2760_v50, 6 }
 0x466   :  { %v863_v55 = vrot.slane %v861_v49, 3 }
 0x468   :  { %898 = vmatmul.mubr.bf16.vlgmr.msra.gmra.mrb[16].mxu0 %v863_v55  ;;  %1918 = vmatmul.mubr.bf16.vlgmr.msra.gmra.mrb[24].mxu1 %v863_v55 }
 0x469   :  { %973 = vmatpush1.bf16.msra.mxu0 %v2475_v4  ;;  %1922 = vmatpush3.bf16.msra.mxu1 %v2522_v26 }
 0x46a   :  { %974 = vmatprep.subr.bf16.mxu0 %v2479_v6  ;;  %1923 = vmatprep.subr.bf16.mxu1 %v2388_v17 }
 0x46b   :  { %1004 = vmatprep.mubr.bf16.mxu0 %v2387_v0  ;;  %1937 = vmatprep.mubr.msk.bf16.mxu1 %vm2389_vm1, %v2388_v17 }
 0x46d   :  { %975 = vmatpush1.bf16.msra.mxu0 %v2481_v8  ;;  %1924 = vmatpush3.bf16.msra.mxu1 %v2533_v29 }
 0x46e   :  { %976 = vmatprep.subr.bf16.mxu0 %v2484_v10  ;;  %1925 = vmatprep.subr.bf16.mxu1 %v2388_v17 }
 0x471   :  { %977 = vmatpush1.bf16.msra.mxu0 %v2487_v12  ;;  %1926 = vmatpush3.bf16.msra.mxu1 %v2541_v30 }
 0x472   :  { %978 = vmatprep.subr.bf16.mxu0 %v2490_v13  ;;  %1927 = vmatprep.subr.bf16.mxu1 %v2388_v17 }
 0x475   :  { %979 = vmatpush1.bf16.msra.mxu0 %v2496_v16  ;;  %1928 = vmatpush3.bf16.msra.mxu1 %v2547_v31 }
 0x476   :  { %980 = vmatprep.subr.bf16.mxu0 %v2500_v18  ;;  %1929 = vmatprep.subr.bf16.mxu1 %v2388_v17 }
 0x479   :  { %981 = vmatpush1.bf16.msra.mxu0 %v2504_v20  ;;  %1930 = vmatpush3.bf16.msra.mxu1 %v2554_v32 }
 0x47a   :  { %982 = vmatprep.subr.bf16.mxu0 %v2508_v21  ;;  %1931 = vmatprep.subr.bf16.mxu1 %v2388_v17 }
 0x47d   :  { %983 = vmatpush1.bf16.msra.mxu0 %v2513_v23  ;;  %1932 = vmatpush3.bf16.msra.mxu1 %v2560_v33 }
 0x47e   :  { %984 = vmatprep.subr.bf16.mxu0 %v2517_v24  ;;  %1933 = vmatprep.subr.bf16.mxu1 %v2388_v17 }
 0x481   :  { %985 = vmatpush1.bf16.msra.mxu0 %v2519_v25  ;;  %1934 = vmatpush3.bf16.msra.mxu1 %v2566_v34 }
 0x482   :  { %986 = vmatprep.subr.bf16.mxu0 %v2526_v27  ;;  %1935 = vmatprep.subr.bf16.mxu1 %v2388_v17 }
 0x485   :  { %987 = vmatpush1.bf16.msra.mxu0 %v2531_v28  ;;  %1936 = vmatpush3.bf16.msra.mxu1 %v2572_v35 }
 0x486   :  { %1091 = vmatprep.subr.bf16.mxu0 %v2473_v2  ;;  %1941 = vmatprep.subr.bf16.mxu1 %v2388_v17 }
 0x53b   :  { %v899_v39 = vpop.f32.mrb[16].mxu0  ;;  %v940_v53 = vpop.f32.mrb[24].mxu1 }
 0x53c   :  { %v946_v52 = vadd.f32 %v899_v39, %v2607_v46  ;;  %v901_v51 = vpop.f32.mrb[17].mxu0  ;;  %v1919_v57 = vpop.f32.mrb[25].mxu1  ;;  %v960_v14 = vadd.f32 %v2622_v11, %v940_v53 }
 0x53d   :  { %v953_v58 = vadd.f32 %v901_v51, %v2609_v48  ;;  %v903_v59 = vpop.f32.mrb[18].mxu0  ;;  %v943_v61 = vpop.f32.mrb[26].mxu1 }
 0x53e   :  { %v1673_v62 = vmul.f32 -1.442695, %v946_v52  ;;  %v904_v63 = vpop.f32.mrb[19].mxu0  ;;  %v1920_v1 = vpop.f32.mrb[27].mxu1 }
 0x53f   :  { %v1674_v3 = vmul.f32 -1.442695, %v953_v58 }
 0x540   :  { %2252 = vpow2.f32 %v1673_v62 }
 0x541   :  { %2254 = vpow2.f32 %v1674_v3  ;;  %v2295_v3 = vld [vmem:[#allocation5] ss:$12 sps:$4 sm:$0xff]  }
 0x54a   :  { %v2253_v5 = vpop.eup %2252 }
 0x54b   :  { %v2255_v2 = vpop.eup %2254  ;;  %v950_v7 = vadd.f32 1.0, %v2253_v5  ;;  %v2296_v5 = vld [vmem:[#allocation5 + $0x1c] ss:$12 sps:$4 sm:$0xff]  }
 0x54c   :  { %v957_v9 = vadd.f32 1.0, %v2255_v2  ;;  %v2297_v2 = vld [vmem:[#allocation5 + $0x18] ss:$12 sps:$4 sm:$0xff]  }
 0x54d   :  { %2256 = vrcp.f32 %v950_v7  ;;  %v2298_v7 = vld [vmem:[#allocation5 + $0x34] ss:$12 sps:$4 sm:$0xff]  }
 0x54e   :  { %2258 = vrcp.f32 %v957_v9  ;;  %v2299_v9 = vld [vmem:[#allocation5 + $0x30] ss:$12 sps:$4 sm:$0xff]  }
 0x557   :  { %v2257_v15 = vpop.eup %2256 }
 0x558   :  { %v2259_v22 = vpop.eup %2258  ;;  %v961_v36 = vmul.f32 %v2257_v15, %v960_v14  ;;  %v2302_v14 = vld [vmem:[#allocation5 + $0x64] ss:$12 sps:$4 sm:$0xff]   ;;  %v2304_v15 = vld [vmem:[#allocation5 + $0x7c] ss:$12 sps:$4 sm:$0xff]  }
 0x559   :  { %v969_v37 = vmul.f32 %v2259_v22, %v967_v19  ;;  %v964_v40 = vsub.f32 1.0, %v2259_v22  ;;  %v2306_v19 = vld [vmem:[#allocation5 + $0x94] ss:$12 sps:$4 sm:$0xff]   ;;  %v2308_v22 = vld [vmem:[#allocation5 + $0xac] ss:$12 sps:$4 sm:$0xff]  }
 0x55a   :  { %v962_v38 = vadd.f32 %v961_v36, %v2611_v54 }
 0x55c   :  { %2260 = vtanh.f32 %v962_v38 }
 0x566   :  { %v2261_v56 = vpop.eup %2260 }
 0x567   :  { %v965_v41 = vmul.f32 %v2261_v56, %v964_v40 }
 0x569   :  { %v2804_v42 = vadd.f32 %v969_v37, %v965_v41 }
 0x56b   :  { %v971_v43 = vpack.c.bf16 %v2804_v42, %v2804_v42  ;;  %v1083_v39 = vrot.slane %v2804_v42, 6 }
 0x56d   :  { %1005 = vmatmul.mubr.bf16.vlgmr.msra.gmra.mrb[20].mxu0 %v971_v43  ;;  %1938 = vmatmul.mubr.bf16.vlgmr.msra.gmra.mrb[28].mxu1 %v971_v43 }
 0x56e   :  { %1092 = vmatpush1.bf16.msra.mxu0 %v2475_v4  ;;  %1942 = vmatpush3.bf16.msra.mxu1 %v2522_v26  ;;  %v2294_v4 = vld [vmem:[#allocation5 + $0x4] ss:$12 sps:$4 sm:$0xff]  }
 0x56f   :  { %1093 = vmatprep.subr.bf16.mxu0 %v2479_v6  ;;  %1943 = vmatprep.subr.bf16.mxu1 %v2388_v17 }
 0x570   :  { %1123 = vmatprep.mubr.bf16.mxu0 %v2387_v0  ;;  %1957 = vmatprep.mubr.msk.bf16.mxu1 %vm2389_vm1, %v2388_v17 }
 0x572   :  { %1094 = vmatpush1.bf16.msra.mxu0 %v2481_v8  ;;  %1944 = vmatpush3.bf16.msra.mxu1 %v2533_v29 }
 0x573   :  { %1095 = vmatprep.subr.bf16.mxu0 %v2484_v10  ;;  %1945 = vmatprep.subr.bf16.mxu1 %v2388_v17 }
 0x576   :  { %1096 = vmatpush1.bf16.msra.mxu0 %v2487_v12  ;;  %1946 = vmatpush3.bf16.msra.mxu1 %v2541_v30 }
 0x577   :  { %1097 = vmatprep.subr.bf16.mxu0 %v2490_v13  ;;  %1947 = vmatprep.subr.bf16.mxu1 %v2388_v17 }
 0x57a   :  { %1098 = vmatpush1.bf16.msra.mxu0 %v2496_v16  ;;  %1948 = vmatpush3.bf16.msra.mxu1 %v2547_v31 }
 0x57b   :  { %1099 = vmatprep.subr.bf16.mxu0 %v2500_v18  ;;  %1949 = vmatprep.subr.bf16.mxu1 %v2388_v17 }
 0x57e   :  { %1100 = vmatpush1.bf16.msra.mxu0 %v2504_v20  ;;  %1950 = vmatpush3.bf16.msra.mxu1 %v2554_v32 }
 0x57f   :  { %1101 = vmatprep.subr.bf16.mxu0 %v2508_v21  ;;  %1951 = vmatprep.subr.bf16.mxu1 %v2388_v17 }
 0x582   :  { %1102 = vmatpush1.bf16.msra.mxu0 %v2513_v23  ;;  %1952 = vmatpush3.bf16.msra.mxu1 %v2560_v33 }
 0x583   :  { %1103 = vmatprep.subr.bf16.mxu0 %v2517_v24  ;;  %1953 = vmatprep.subr.bf16.mxu1 %v2388_v17 }
 0x586   :  { %1104 = vmatpush1.bf16.msra.mxu0 %v2519_v25  ;;  %1954 = vmatpush3.bf16.msra.mxu1 %v2566_v34 }
 0x587   :  { %1105 = vmatprep.subr.bf16.mxu0 %v2526_v27  ;;  %1955 = vmatprep.subr.bf16.mxu1 %v2388_v17 }
 0x58a   :  { %1106 = vmatpush1.bf16.msra.mxu0 %v2531_v28  ;;  %1956 = vmatpush3.bf16.msra.mxu1 %v2572_v35 }
 0x58b   :  { %1210 = vmatprep.subr.bf16.mxu0 %v2294_v4  ;;  %1961 = vmatprep.subr.bf16.mxu1 %v2388_v17 }
 0x640   :  { %v1006_v6 = vpop.f32.mrb[20].mxu0  ;;  %v1047_v8 = vpop.f32.mrb[28].mxu1 }
 0x641   :  { %v1054_v10 = vrot.slane %v1006_v6, 6  ;;  %v1008_v12 = vpop.f32.mrb[21].mxu0  ;;  %v1939_v13 = vpop.f32.mrb[29].mxu1  ;;  %v1073_v50 = vadd.f32 %v2622_v11, %v1047_v8 }
 0x642   :  { %v1064_v16 = vrot.slane %v1008_v12, 6  ;;  %v1010_v18 = vpop.f32.mrb[22].mxu0  ;;  %v1050_v20 = vpop.f32.mrb[30].mxu1 }
 0x643   :  { %v1056_v21 = vadd.f32 %v1054_v10, %v2607_v46  ;;  %v1011_v23 = vpop.f32.mrb[23].mxu0  ;;  %v1940_v24 = vpop.f32.mrb[31].mxu1  ;;  %v1075_v49 = vrot.slane %v1073_v50, 6 }
 0x644   :  { %v1066_v25 = vadd.f32 %v1064_v16, %v2609_v48 }
 0x645   :  { %v1675_v27 = vmul.f32 -1.442695, %v1056_v21 }
 0x646   :  { %v1676_v28 = vmul.f32 -1.442695, %v1066_v25 }
 0x647   :  { %2262 = vpow2.f32 %v1675_v27 }
 0x648   :  { %2264 = vpow2.f32 %v1676_v28 }
 0x651   :  { %v2263_v60 = vpop.eup %2262 }
 0x652   :  { %v2265_v44 = vpop.eup %2264  ;;  %v1060_v45 = vadd.f32 1.0, %v2263_v60 }
 0x653   :  { %v1070_v47 = vadd.f32 1.0, %v2265_v44 }
 0x654   :  { %2266 = vrcp.f32 %v1060_v45 }
 0x655   :  { %2268 = vrcp.f32 %v1070_v47 }
 0x65e   :  { %v2267_v55 = vpop.eup %2266 }
 0x65f   :  { %v2269_v53 = vpop.eup %2268  ;;  %v1077_v52 = vmul.f32 %v2267_v55, %v1075_v49  ;;  %v1326_v55 = vld [vmem:[%s3039_s7 + $0x8] sm:$0xff] }
 0x660   :  { %v1085_v51 = vmul.f32 %v2269_v53, %v1083_v39  ;;  %v1080_v58 = vsub.f32 1.0, %v2269_v53  ;;  %v2390_v53 = vmov 0.0|0.0  }
 0x661   :  { %v1078_v57 = vadd.f32 %v1077_v52, %v2611_v54  ;;  %v1327_v52 = vld [vmem:[%s3039_s7 + $0x10] sm:$0xff] }
 0x663   :  { %2270 = vtanh.f32 %v1078_v57 }
 0x66d   :  { %v2271_v59 = vpop.eup %2270 }
 0x66e   :  { %v1081_v61 = vmul.f32 %v2271_v59, %v1080_v58  ;;  %v1329_v58 = vld [vmem:[%s3039_s7 + $0x20] sm:$0xff]  ;;  %v1330_v59 = vld [vmem:[%s3039_s7 + $0x28] sm:$0xff] }
 0x670   :  { %v2847_v62 = vadd.f32 %v1085_v51, %v1081_v61  ;;  %v1328_v51 = vld [vmem:[%s3039_s7 + $0x18] sm:$0xff]  ;;  %v2093_v61 = vpack.c.bf16 %v1330_v59, %v1329_v58  ;;  %v1518_v58 = vld [vmem:[%s3040_s8 + $0x28] sm:$0xff] }
 0x671   :  { %v2090_v57 = vpack.c.bf16 %v1328_v51, %v1327_v52 }
 0x672   :  { %v1087_v63 = vpack.c.bf16 %v2847_v62, %v2847_v62  ;;  %v1202_v23 = vrot.slane %v2847_v62, 6  ;;  %v1331_v62 = vld [vmem:[%s3039_s7 + $0x30] sm:$0xff] }
 0x674   :  { %v1089_v1 = vrot.slane %v1087_v63, 1  ;;  %v1332_v63 = vld [vmem:[%s3039_s7 + $0x38] sm:$0xff] }
 0x676   :  { %1124 = vmatmul.mubr.bf16.vlgmr.msra.gmra.mrb[24].mxu0 %v1089_v1  ;;  %1958 = vmatmul.mubr.bf16.vlgmr.msra.gmra.mrb[32].mxu1 %v1089_v1  ;;  %v2096_v1 = vpack.c.bf16 %v1332_v63, %v1331_v62  ;;  %v1520_v62 = vld [vmem:[%s3040_s8 + $0x38] sm:$0xff] }
 0x677   :  { %1211 = vmatpush1.bf16.msra.mxu0 %v2295_v3  ;;  %1962 = vmatpush3.bf16.msra.mxu1 %v2522_v26  ;;  %v2300_v26 = vld [vmem:[#allocation5 + $0x4c] ss:$12 sps:$4 sm:$0xff]  }
 0x678   :  { %1212 = vmatprep.subr.bf16.mxu0 %v2296_v5  ;;  %1963 = vmatprep.subr.bf16.mxu1 %v2388_v17  ;;  %v1333_v3 = vld [vmem:[%s3039_s7 + $0x40] sm:$0xff]  ;;  %v1334_v5 = vld [vmem:[%s3039_s7 + $0x48] sm:$0xff] }
 0x679   :  { %1242 = vmatprep.mubr.bf16.mxu0 %v2387_v0  ;;  %1977 = vmatprep.mubr.msk.bf16.mxu1 %vm2389_vm1, %v2388_v17  ;;  %v2301_v0 = vld [vmem:[#allocation5 + $0x48] ss:$12 sps:$4 sm:$0xff]  }
 0x67b   :  { %1213 = vmatpush1.bf16.msra.mxu0 %v2297_v2  ;;  %1964 = vmatpush3.bf16.msra.mxu1 %v2533_v29  ;;  %v2303_v29 = vld [vmem:[#allocation5 + $0x60] ss:$12 sps:$4 sm:$0xff]   ;;  %v2099_v2 = vpack.c.bf16 %v1334_v5, %v1333_v3 }
 0x67c   :  { %1214 = vmatprep.subr.bf16.mxu0 %v2298_v7  ;;  %1965 = vmatprep.subr.bf16.mxu1 %v2388_v17  ;;  %v1335_v7 = vld [vmem:[%s3039_s7 + $0x50] sm:$0xff]  ;;  %v1522_v3 = vld [vmem:[%s3040_s8 + $0x48] sm:$0xff] }
 0x67f   :  { %1215 = vmatpush1.bf16.msra.mxu0 %v2299_v9  ;;  %1966 = vmatpush3.bf16.msra.mxu1 %v2541_v30  ;;  %v2305_v30 = vld [vmem:[#allocation5 + $0x78] ss:$12 sps:$4 sm:$0xff]   ;;  %v1336_v9 = vld [vmem:[%s3039_s7 + $0x58] sm:$0xff] }
 0x680   :  { %1216 = vmatprep.subr.bf16.mxu0 %v2300_v26  ;;  %1967 = vmatprep.subr.bf16.mxu1 %v2388_v17  ;;  %v2102_v26 = vpack.c.bf16 %v1336_v9, %v1335_v7  ;;  %v1524_v7 = vld [vmem:[%s3040_s8 + $0x58] sm:$0xff] }
 0x683   :  { %1217 = vmatpush1.bf16.msra.mxu0 %v2301_v0  ;;  %1968 = vmatpush3.bf16.msra.mxu1 %v2547_v31  ;;  %v2307_v31 = vld [vmem:[#allocation5 + $0x90] ss:$12 sps:$4 sm:$0xff]  }
 0x684   :  { %1218 = vmatprep.subr.bf16.mxu0 %v2302_v14  ;;  %1969 = vmatprep.subr.bf16.mxu1 %v2388_v17  ;;  %v1337_v0 = vld [vmem:[%s3039_s7 + $0x60] sm:$0xff]  ;;  %v1338_v14 = vld [vmem:[%s3039_s7 + $0x68] sm:$0xff] }
 0x687   :  { %1219 = vmatpush1.bf16.msra.mxu0 %v2303_v29  ;;  %1970 = vmatpush3.bf16.msra.mxu1 %v2554_v32  ;;  %v2309_v32 = vld [vmem:[#allocation5 + $0xa8] ss:$12 sps:$4 sm:$0xff]   ;;  %v2105_v29 = vpack.c.bf16 %v1338_v14, %v1337_v0  ;;  %v1526_v0 = vld [vmem:[%s3040_s8 + $0x68] sm:$0xff] }
 0x688   :  { %1220 = vmatprep.subr.bf16.mxu0 %v2304_v15  ;;  %1971 = vmatprep.subr.bf16.mxu1 %v2388_v17  ;;  %v1339_v15 = vld [vmem:[%s3039_s7 + $0x70] sm:$0xff] }
 0x68b   :  { %1221 = vmatpush1.bf16.msra.mxu0 %v2305_v30  ;;  %1972 = vmatpush3.bf16.msra.mxu1 %v2560_v33  ;;  %v1340_v30 = vld [vmem:[%s3039_s7 + $0x78] sm:$0xff] }
 0x68c   :  { %1222 = vmatprep.subr.bf16.mxu0 %v2306_v19  ;;  %1973 = vmatprep.subr.bf16.mxu1 %v2388_v17  ;;  %v2108_v19 = vpack.c.bf16 %v1340_v30, %v1339_v15  ;;  %v1528_v15 = vld [vmem:[%s3040_s8 + $0x78] sm:$0xff] }
 0x68f   :  { %1223 = vmatpush1.bf16.msra.mxu0 %v2307_v31  ;;  %1974 = vmatpush3.bf16.msra.mxu1 %v2566_v34 }
 0x690   :  { %1224 = vmatprep.subr.bf16.mxu0 %v2308_v22  ;;  %1975 = vmatprep.subr.bf16.mxu1 %v2388_v17 }
 0x693   :  { %1225 = vmatpush1.bf16.msra.mxu0 %v2309_v32  ;;  %1976 = vmatpush3.bf16.msra.mxu1 %v2572_v35 }
 0x694   :  { %2086 = vmatprep.subr.bf16.mxu0 %v2390_v53  ;;  %2110 = vmatprep.subr.bf16.mxu1 %v2390_v53 }
 0x749   :  { %v1125_v36 = vpop.f32.mrb[24].mxu0  ;;  %v1166_v37 = vpop.f32.mrb[32].mxu1 }
 0x74a   :  { %v1173_v38 = vrot.slane %v1125_v36, 4  ;;  %v1127_v33 = vpop.f32.mrb[25].mxu0  ;;  %v1959_v40 = vpop.f32.mrb[33].mxu1  ;;  %v1192_v18 = vadd.f32 %v2622_v11, %v1166_v37  ;;  %v1325_v11 = vld [vmem:[%s3039_s7] sm:$0xff] }
 0x74b   :  { %v1183_v56 = vrot.slane %v1127_v33, 4  ;;  %v1129_v41 = vpop.f32.mrb[26].mxu0  ;;  %v1169_v42 = vpop.f32.mrb[34].mxu1  ;;  %v2087_v39 = vpack.c.bf16 %v1326_v55, %v1325_v11 }
 0x74c   :  { %v1175_v43 = vadd.f32 %v1173_v38, %v2607_v46  ;;  %v1130_v4 = vpop.f32.mrb[27].mxu0  ;;  %v1960_v34 = vpop.f32.mrb[35].mxu1  ;;  %v1194_v20 = vrot.slane %v1192_v18, 4 }
 0x74d   :  { %v1185_v6 = vadd.f32 %v1183_v56, %v2609_v48 }
 0x74e   :  { %v1677_v8 = vmul.f32 -1.442695, %v1175_v43 }
 0x74f   :  { %v1678_v10 = vmul.f32 -1.442695, %v1185_v6 }
 0x750   :  { %2272 = vpow2.f32 %v1677_v8 }
 0x751   :  { %2274 = vpow2.f32 %v1678_v10 }
 0x75a   :  { %v2273_v12 = vpop.eup %2272 }
 0x75b   :  { %v2275_v35 = vpop.eup %2274  ;;  %v1179_v13 = vadd.f32 1.0, %v2273_v12 }
 0x75c   :  { %v1189_v16 = vadd.f32 1.0, %v2275_v35  ;;  %v2310_v35 = vld [vmem:[%s3036_s4] ss:$0 sm:$0xff] }
 0x75d   :  { %2276 = vrcp.f32 %v1179_v13 }
 0x75e   :  { %2278 = vrcp.f32 %v1189_v16 }
 0x767   :  { %v2277_v21 = vpop.eup %2276 }
 0x768   :  { %v2279_v24 = vpop.eup %2278  ;;  %v1196_v25 = vmul.f32 %v2277_v21, %v1194_v20 }
 0x769   :  { %v1204_v27 = vmul.f32 %v2279_v24, %v1202_v23  ;;  %v1199_v60 = vsub.f32 1.0, %v2279_v24 }
 0x76a   :  { %v1197_v28 = vadd.f32 %v1196_v25, %v2611_v54 }
 0x76c   :  { %2280 = vtanh.f32 %v1197_v28 }
 0x776   :  { %v2281_v44 = vpop.eup %2280 }
 0x777   :  { %v1200_v45 = vmul.f32 %v2281_v44, %v1199_v60  ;;  %v1513_v44 = vld [vmem:[%s3040_s8] sm:$0xff] }
 0x779   :  { %v2874_v47 = vadd.f32 %v1204_v27, %v1200_v45  ;;  %v1514_v45 = vld [vmem:[%s3040_s8 + $0x8] sm:$0xff] }
 0x77b   :  { %v1206_v50 = vpack.c.bf16 %v2874_v47, %v2874_v47  ;;  %v1321_v18 = vrot.slane %v2874_v47, 6  ;;  %v2135_v47 = vpack.c.bf16 %v1514_v45, %v1513_v44 }
 0x77d   :  { %v1208_v49 = vrot.slane %v1206_v50, 2  ;;  %v1516_v50 = vld [vmem:[%s3040_s8 + $0x18] sm:$0xff] }
 0x77f   :  { %1243 = vmatmul.mubr.bf16.vlgmr.msra.gmra.mrb[28].mxu0 %v1208_v49  ;;  %1978 = vmatmul.mubr.bf16.vlgmr.msra.gmra.mrb[36].mxu1 %v1208_v49 }
 0x780   :  { %2013 = vmatprep.mubr.msk.f32.mxu0 %vm2389_vm1, %v2388_v17  ;;  %2048 = vmatprep.mubr.msk.f32.mxu1 %vm2389_vm1, %v2388_v17 }
 0x781   :  { %2088 = vmatpush3.bf16.msra.mxu0 %v2087_v39  ;;  %2112 = vmatpush3.bf16.msra.mxu1 %v2087_v39 }
 0x782   :  { %2089 = vmatprep.subr.bf16.mxu0 %v2390_v53  ;;  %2113 = vmatprep.subr.bf16.mxu1 %v2390_v53 }
 0x785   :  { %2091 = vmatpush3.bf16.msra.mxu0 %v2090_v57  ;;  %2115 = vmatpush3.bf16.msra.mxu1 %v2090_v57  ;;  %v1517_v57 = vld [vmem:[%s3040_s8 + $0x20] sm:$0xff] }
 0x786   :  { %2092 = vmatprep.subr.bf16.mxu0 %v2390_v53  ;;  %2116 = vmatprep.subr.bf16.mxu1 %v2390_v53  ;;  %v2141_v59 = vpack.c.bf16 %v1518_v58, %v1517_v57 }
 0x789   :  { %2094 = vmatpush3.bf16.msra.mxu0 %v2093_v61  ;;  %2118 = vmatpush3.bf16.msra.mxu1 %v2093_v61  ;;  %v1519_v61 = vld [vmem:[%s3040_s8 + $0x30] sm:$0xff] }
 0x78a   :  { %2095 = vmatprep.subr.bf16.mxu0 %v2390_v53  ;;  %2119 = vmatprep.subr.bf16.mxu1 %v2390_v53  ;;  %v2144_v63 = vpack.c.bf16 %v1520_v62, %v1519_v61 }
 0x78d   :  { %2097 = vmatpush3.bf16.msra.mxu0 %v2096_v1  ;;  %2121 = vmatpush3.bf16.msra.mxu1 %v2096_v1  ;;  %v1521_v1 = vld [vmem:[%s3040_s8 + $0x40] sm:$0xff] }
 0x78e   :  { %2098 = vmatprep.subr.bf16.mxu0 %v2390_v53  ;;  %2122 = vmatprep.subr.bf16.mxu1 %v2390_v53  ;;  %v2147_v5 = vpack.c.bf16 %v1522_v3, %v1521_v1 }
 0x791   :  { %2100 = vmatpush3.bf16.msra.mxu0 %v2099_v2  ;;  %2124 = vmatpush3.bf16.msra.mxu1 %v2099_v2  ;;  %v1523_v2 = vld [vmem:[%s3040_s8 + $0x50] sm:$0xff] }
 0x792   :  { %2101 = vmatprep.subr.bf16.mxu0 %v2390_v53  ;;  %2125 = vmatprep.subr.bf16.mxu1 %v2390_v53  ;;  %v2150_v9 = vpack.c.bf16 %v1524_v7, %v1523_v2 }
 0x795   :  { %2103 = vmatpush3.bf16.msra.mxu0 %v2102_v26  ;;  %2127 = vmatpush3.bf16.msra.mxu1 %v2102_v26  ;;  %v1525_v26 = vld [vmem:[%s3040_s8 + $0x60] sm:$0xff] }
 0x796   :  { %2104 = vmatprep.subr.bf16.mxu0 %v2390_v53  ;;  %2128 = vmatprep.subr.bf16.mxu1 %v2390_v53  ;;  %v2153_v14 = vpack.c.bf16 %v1526_v0, %v1525_v26 }
 0x799   :  { %2106 = vmatpush3.bf16.msra.mxu0 %v2105_v29  ;;  %2130 = vmatpush3.bf16.msra.mxu1 %v2105_v29  ;;  %v1527_v29 = vld [vmem:[%s3040_s8 + $0x70] sm:$0xff] }
 0x79a   :  { %2107 = vmatprep.subr.bf16.mxu0 %v2390_v53  ;;  %2131 = vmatprep.subr.bf16.mxu1 %v2390_v53  ;;  %v2156_v30 = vpack.c.bf16 %v1528_v15, %v1527_v29 }
 0x79d   :  { %2109 = vmatpush3.bf16.msra.mxu0 %v2108_v19  ;;  %2133 = vmatpush3.bf16.msra.mxu1 %v2108_v19 }
 0x79e   :  { %2134 = vmatprep.subr.bf16.mxu0 %v2390_v53 }
 0x852   :  { %v1244_v31 = vpop.f32.mrb[28].mxu0  ;;  %v1285_v22 = vpop.f32.mrb[36].mxu1 }
 0x853   :  { %v1292_v32 = vrot.slane %v1244_v31, 2  ;;  %v1246_v36 = vpop.f32.mrb[29].mxu0  ;;  %v1979_v37 = vpop.f32.mrb[37].mxu1  ;;  %v1311_v13 = vadd.f32 %v2310_v35, %v1285_v22 }
 0x854   :  { %v1302_v38 = vrot.slane %v1246_v36, 2  ;;  %v1248_v33 = vpop.f32.mrb[30].mxu0  ;;  %v1288_v40 = vpop.f32.mrb[38].mxu1 }
 0x855   :  { %v1294_v56 = vadd.f32 %v1292_v32, %v2607_v46  ;;  %v1249_v41 = vpop.f32.mrb[31].mxu0  ;;  %v1980_v42 = vpop.f32.mrb[39].mxu1  ;;  %v1313_v46 = vrot.slane %v1311_v13, 2 }
 0x856   :  { %v1304_v43 = vadd.f32 %v1302_v38, %v2609_v48  ;;  %v1682_v38 = vld [vmem:[%s3038_s6] ss:$0 sm:$0xff] }
 0x857   :  { %v1679_v4 = vmul.f32 -1.442695, %v1294_v56  ;;  %v1683_v41 = vld [vmem:[%s3041_s9] ss:$0 sm:$0xff] }
 0x858   :  { %v1680_v34 = vmul.f32 -1.442695, %v1304_v43 }
 0x859   :  { %2282 = vpow2.f32 %v1679_v4 }
 0x85a   :  { %2284 = vpow2.f32 %v1680_v34 }
 0x863   :  { %v2283_v6 = vpop.eup %2282 }
 0x864   :  { %v2285_v8 = vpop.eup %2284  ;;  %v1298_v10 = vadd.f32 1.0, %v2283_v6 }
 0x865   :  { %v1308_v12 = vadd.f32 1.0, %v2285_v8 }
 0x866   :  { %2286 = vrcp.f32 %v1298_v10 }
 0x867   :  { %2288 = vrcp.f32 %v1308_v12 }
 0x870   :  { %v2287_v16 = vpop.eup %2286 }
 0x871   :  { %v2289_v48 = vpop.eup %2288  ;;  %v1315_v20 = vmul.f32 %v2287_v16, %v1313_v46 }
 0x872   :  { %v1323_v21 = vmul.f32 %v2289_v48, %v1321_v18  ;;  %v1318_v24 = vsub.f32 1.0, %v2289_v48 }
 0x873   :  { %v1316_v23 = vadd.f32 %v1315_v20, %v2611_v54  ;;  %v1515_v54 = vld [vmem:[%s3040_s8 + $0x10] sm:$0xff] }
 0x874   :  { %v2138_v49 = vpack.c.bf16 %v1516_v50, %v1515_v54 }
 0x875   :  { %2290 = vtanh.f32 %v1316_v23 }
 0x87f   :  { %v2291_v25 = vpop.eup %2290 }
 0x880   :  { %v1319_v27 = vmul.f32 %v2291_v25, %v1318_v24 }
 0x882   :  { %v1324_v28 = vadd.f32 %v1323_v21, %v1319_v27 }
 0x884   :  { %v1342_v60 = vrot.slane %v1324_v28, 6 }
 0x886   :  { %2014 = vmatmul.mubr.f32.vlgmr.msra.gmra.mrb[32].mxu0 %v1342_v60 }
 0x887   :  { %2083 = vmatprep.mubr.msk.f32.mxu0 %vm2389_vm1, %v2388_v17  ;;  %2136 = vmatpush3.bf16.msra.mxu0 %v2135_v47 }
 0x888   :  { %2137 = vmatprep.subr.bf16.mxu0 %v2390_v53 }
 0x88b   :  { %2139 = vmatpush3.bf16.msra.mxu0 %v2138_v49 }
 0x88c   :  { %2140 = vmatprep.subr.bf16.mxu0 %v2390_v53 }
 0x88f   :  { %2142 = vmatpush3.bf16.msra.mxu0 %v2141_v59 }
 0x890   :  { %2143 = vmatprep.subr.bf16.mxu0 %v2390_v53 }
 0x893   :  { %2145 = vmatpush3.bf16.msra.mxu0 %v2144_v63 }
 0x894   :  { %2146 = vmatprep.subr.bf16.mxu0 %v2390_v53 }
 0x897   :  { %2148 = vmatpush3.bf16.msra.mxu0 %v2147_v5 }
 0x898   :  { %2149 = vmatprep.subr.bf16.mxu0 %v2390_v53 }
 0x89b   :  { %2151 = vmatpush3.bf16.msra.mxu0 %v2150_v9 }
 0x89c   :  { %2152 = vmatprep.subr.bf16.mxu0 %v2390_v53 }
 0x89f   :  { %2154 = vmatpush3.bf16.msra.mxu0 %v2153_v14 }
 0x8a0   :  { %2155 = vmatprep.subr.bf16.mxu0 %v2390_v53  ;;  %v1681_v53 = vld [vmem:[%s3037_s5] ss:$0 sm:$0xff]  ;;  %s2355_s5 = scalar_lea.vmem %s1619_s0, 32 }
 0x8a1   :  { %p2356_p2 = scmp.ne.s32.totalorder %s1619_s0, %s2355_s5  ;;  %p2361_p4 = scmp.lt.s32.totalorder %s2355_s5, %s2355_s5 }
 0x8a3   :  { %2157 = vmatpush3.bf16.msra.mxu0 %v2156_v30  ;;  %p2362_p5 = por %p2361_p4, %p2360_p3 }
 0x8a5   :  { %p2363_p6 = pnand %p2362_p5, %p2356_p2 }
 0x959   :  { %v1410_v17 = vpop.f32.mrb[32].mxu0 }
 0x95a   :  { %v1415_v11 = vrot.slane %v1410_v17, 2  ;;  %v2015_v55 = vpop.f32.mrb[33].mxu0 }
 0x95c   :  { %v1417_v39 = vsub.f32 %v1324_v28, %v1415_v11 }
 0x95e   :  { %v1418_v52 = vmul.f32 %v1417_v39, %v1417_v39 }
 0x960   :  { %v1420_v51 = vrot.slane %v1418_v52, 6 }
 0x962   :  { %2049 = vmatmul.mubr.f32.vlgmr.msra.gmra.mrb[40].mxu1 %v1420_v51 }
 0xa35   :  { %v1488_v19 = vpop.f32.mrb[40].mxu1 }
 0xa36   :  { %v1489_v31 = vadd.f32 1e-05, %v1488_v19  ;;  %v2050_v22 = vpop.f32.mrb[41].mxu1 }
 0xa38   :  { %2292 = vrsqrt.f32 %v1489_v31 }
 0xa42   :  { %v2293_v32 = vpop.eup %2292 }
 0xa43   :  { %v1494_v36 = vrot.slane %v2293_v32, 2 }
 0xa45   :  { %v1496_v37 = vmul.f32 %v1494_v36, %v1417_v39 }
 0xa47   :  { %v1504_v33 = vmul.f32 %v1681_v53, %v1496_v37 }
 0xa49   :  { %v1512_v40 = vadd.f32 %v1682_v38, %v1504_v33 }
 0xa4b   :  { %v1537_v56 = vrot.slane %v1512_v40, 6 }
 0xa4d   :  { %2084 = vmatmul.mubr.f32.vlgmr.msra.gmra.mrb[34].mxu0 %v1537_v56 }
 0xb20   :  { %v1605_v42 = vpop.f32.mrb[34].mxu0 }
 0xb21   :  { %v1606_v43 = vadd.f32 %v1683_v41, %v1605_v42  ;;  %v2085_v4 = vpop.f32.mrb[35].mxu0 }
 0xb23   :  { %v1609_v34 = vmul.f32 0.33333334, %v1606_v43 }
 0xb25   :  { %1611 = vst.msk [vmem:[#allocation7] sm:$0x3] %vm1610_vm2, %v1609_v34 }
 0xb26   :  { %2366 = shalt.err (!%p2363_p6)
}
 0xb27   :  { %s2367_s9 = scalar_lea.hbm %s3042_s10, 32 }
 0xb28   :  { %p2368_p7 = scmp.ne.s32.totalorder %s3042_s10, %s2367_s9  ;;  %p2371_p8 = scmp.lt.u32.totalorder %s2367_s9, %s3042_s10 }
 0xb2a   :  { %p2373_p9 = pnand %p2371_p8, %p2368_p7 }
 0xb2c   :  { %2376 = shalt.err (!%p2373_p9)
}
 0xb2d   :  { %1621 = dma.vmem_to_hbm [thread:$0]  %s1619_s0, 32, %s3042_s10, [#allocation4]  }
 0xb2e   :  { %2381 = dma.done.wait [#allocation4], 32  }
 0xb2f   :  { %2382 = vsyncadd [#allocation4], 4294967264 }
 0xb30   :  { %1625 = vsyncpa [#allocation3], 1 }
 0xb31   :  { %1626 = vsyncpa [#allocation6], 1 }
 0xb32   :  { %1627 = vsyncpa [#allocation4], 1 }

</bundles_post_ra>
